<compile_context>
chip_gen: v5e
topology: v5e:2x2
jax: 0.10.0
libtpu: 0.0.40
codegen_flags: <defaults>
</compile_context>

<pallas_src>
import math
import functools

import jax
import jax.numpy as jnp
from jax import lax
from jax.experimental import pallas as pl
from jax.experimental.pallas import tpu as pltpu

# ---------------- model hyper-params (small, deterministic) ----------------
B = 2          # batch
T = 8          # n_steps (decoder and encoder seq length)
BT = B * T     # folded row count
D_MODEL = 32
D_FFN = 64
N_HEADS = 2
D_K = 16
D_V = 16
INV_TEMPERATURE = 1.0 / math.sqrt(D_K)
LN_EPS = 1e-6
NEG_INF = -1e9


# ---------------------------- Pallas kernel --------------------------------
def decoder_layer_kernel(
    # folded inputs
    dec_ref,        # (BT, D_MODEL)
    enc_ref,        # (BT, D_MODEL)
    slf_mask_ref,   # (BT, BT) block-diagonal mask (0 = masked / cross-batch)
    enc_mask_ref,   # (BT, BT)
    # self-attention weights
    wq1_ref, wk1_ref, wv1_ref, fc1_ref,
    # enc-attention weights
    wq2_ref, wk2_ref, wv2_ref, fc2_ref,
    # position-wise FFN + layernorm
    w1_ref, b1_ref, w2_ref, b2_ref, gamma_ref, beta_ref,
    # outputs
    out_ref,        # (BT, D_MODEL)
    slf_attn_ref,   # (N_HEADS, BT, BT)  (block-diagonal; off-blocks exactly 0)
    enc_attn_ref,   # (N_HEADS, BT, BT)
):
    def mha(xq, xkv, wq_ref, wk_ref, wv_ref, wo_ref, mask_ref, attn_ref):
        # Mask handling hoisted out of the head loop: one compare+select,
        # then scores use a single multiply-add per head.
        bias = jnp.where(mask_ref[...] == 0.0, NEG_INF, 0.0).astype(jnp.float32)

        out = jnp.zeros((BT, D_MODEL), jnp.float32)
        for h in range(N_HEADS):  # small static head loop
            # Slice resident VMEM weight columns (cheap), not MXU results.
            q_h = jnp.dot(xq, wq_ref[:, h * D_K:(h + 1) * D_K],
                          preferred_element_type=jnp.float32)
            k_h = jnp.dot(xkv, wk_ref[:, h * D_K:(h + 1) * D_K],
                          preferred_element_type=jnp.float32)
            v_h = jnp.dot(xkv, wv_ref[:, h * D_V:(h + 1) * D_V],
                          preferred_element_type=jnp.float32)

            # q_h @ k_h^T without materializing a transpose.
            scores = lax.dot_general(q_h, k_h, (((1,), (1,)), ((), ())),
                                     preferred_element_type=jnp.float32)
            scores = scores * INV_TEMPERATURE + bias

            m = jnp.max(scores, axis=-1, keepdims=True)
            e = jnp.exp(scores - m)
            denom = jnp.sum(e, axis=-1, keepdims=True)
            attn = e * pl.reciprocal(denom, approx=False)  # EUP, exact
            attn_ref[h] = attn

            head_out = jnp.dot(attn, v_h, preferred_element_type=jnp.float32)
            # concat-then-fc == sum over heads of head_out @ wo[head rows]
            out = out + jnp.dot(head_out, wo_ref[h * D_V:(h + 1) * D_V, :],
                                preferred_element_type=jnp.float32)
        return out

    dec = dec_ref[...]
    enc = enc_ref[...]

    # 1) self multi-head attention
    x = mha(dec, dec, wq1_ref, wk1_ref, wv1_ref, fc1_ref,
            slf_mask_ref, slf_attn_ref)

    # 2) decoder-encoder multi-head attention
    x = mha(x, enc, wq2_ref, wk2_ref, wv2_ref, fc2_ref,
            enc_mask_ref, enc_attn_ref)

    # 3) position-wise FFN with residual + LayerNorm (dropout = identity)
    residual = x
    h1 = jnp.maximum(
        jnp.dot(x, w1_ref[...], preferred_element_type=jnp.float32) + b1_ref[...],
        0.0)
    y = jnp.dot(h1, w2_ref[...], preferred_element_type=jnp.float32) + b2_ref[...]
    y = y + residual
    mean = jnp.mean(y, axis=-1, keepdims=True)
    centered = y - mean
    var = jnp.mean(centered * centered, axis=-1, keepdims=True)
    out_ref[...] = (centered * lax.rsqrt(var + LN_EPS)   # rsqrt on EUP
                    * gamma_ref[...] + beta_ref[...])


# ------------------------------- wrapper ------------------------------------
def transformer_decoder_layer(dec_input, enc_output, slf_mask, enc_mask, params):
    weight_names = ["wq1", "wk1", "wv1", "fc1",
                    "wq2", "wk2", "wv2", "fc2",
                    "w1", "b1", "w2", "b2", "gamma", "beta"]
    weights = [params[n] for n in weight_names]

    # Fold batch into the row (sublane) axis: one kernel call for the whole
    # problem; no grid, so weights are streamed to VMEM exactly once.
    dec2d = dec_input.reshape(BT, D_MODEL)
    enc2d = enc_output.reshape(BT, D_MODEL)

    def block_diag(mask_btt):            # (B, T, T) -> (BT, BT), 0 off-block
        eye = jnp.eye(B, dtype=mask_btt.dtype)
        return jnp.einsum("bc,bij->bicj", eye, mask_btt).reshape(BT, BT)

    slf_full = block_diag(slf_mask)
    enc_full = block_diag(enc_mask)

    vmem = functools.partial(pl.BlockSpec, memory_space=pltpu.MemorySpace.VMEM)
    n_in = 4 + len(weights)

    out2d, slf_attn_full, enc_attn_full = pl.pallas_call(
        decoder_layer_kernel,
        out_shape=(
            jax.ShapeDtypeStruct((BT, D_MODEL), jnp.float32),
            jax.ShapeDtypeStruct((N_HEADS, BT, BT), jnp.float32),
            jax.ShapeDtypeStruct((N_HEADS, BT, BT), jnp.float32),
        ),
        in_specs=[vmem()] * n_in,
        out_specs=(vmem(), vmem(), vmem()),
    )(dec2d, enc2d, slf_full, enc_full, *weights)

    # Layout plumbing back to the PyTorch-facing shapes (XLA-side, free-ish).
    dec_out = out2d.reshape(B, T, D_MODEL)

    def unpack(full):                    # (H, BT, BT) -> (B, H, T, T)
        return jnp.stack(
            [full[:, b * T:(b + 1) * T, b * T:(b + 1) * T] for b in range(B)],
            axis=0)

    return dec_out, unpack(slf_attn_full), unpack(enc_attn_full)


# --------------------------- pure-JAX reference -----------------------------
def reference_forward(dec, enc, slf_mask, enc_mask, p):
    def mha(xq, xkv, wq, wk, wv, wo, mask):
        b, tq, _ = xq.shape
        tk = xkv.shape[1]
        q = (xq @ wq).reshape(b, tq, N_HEADS, D_K).transpose(0, 2, 1, 3)
        k = (xkv @ wk).reshape(b, tk, N_HEADS, D_K).transpose(0, 2, 1, 3)
        v = (xkv @ wv).reshape(b, tk, N_HEADS, D_V).transpose(0, 2, 1, 3)
        scores = jnp.einsum("bhqd,bhkd->bhqk", q, k) * INV_TEMPERATURE
        scores = jnp.where(mask[:, None] == 0, NEG_INF, scores)
        attn = jax.nn.softmax(scores, axis=-1)
        o = jnp.einsum("bhqk,bhkd->bhqd", attn, v)
        o = o.transpose(0, 2, 1, 3).reshape(b, tq, N_HEADS * D_V)
        return o @ wo, attn

    x, slf_attn = mha(dec, dec, p["wq1"], p["wk1"], p["wv1"], p["fc1"], slf_mask)
    x, enc_attn = mha(x, enc, p["wq2"], p["wk2"], p["wv2"], p["fc2"], enc_mask)
    residual = x
    h = jax.nn.relu(x @ p["w1"] + p["b1"])
    y = h @ p["w2"] + p["b2"]
    y = y + residual
    mean = jnp.mean(y, axis=-1, keepdims=True)
    var = jnp.mean((y - mean) ** 2, axis=-1, keepdims=True)
    out = (y - mean) / jnp.sqrt(var + LN_EPS) * p["gamma"] + p["beta"]
    return out, slf_attn, enc_attn


# --------------------------------- main --------------------------------------
if __name__ == "__main__":
    key = jax.random.PRNGKey(0)
    ks = jax.random.split(key, 20)

    def init(k, shape, fan_in):
        return jax.random.normal(k, shape, jnp.float32) / math.sqrt(fan_in)

    params = {
        # self-attention (nn.Linear weights stored transposed as (in, out))
        "wq1": init(ks[0], (D_MODEL, N_HEADS * D_K), D_MODEL),
        "wk1": init(ks[1], (D_MODEL, N_HEADS * D_K), D_MODEL),
        "wv1": init(ks[2], (D_MODEL, N_HEADS * D_V), D_MODEL),
        "fc1": init(ks[3], (N_HEADS * D_V, D_MODEL), N_HEADS * D_V),
        # enc-attention
        "wq2": init(ks[4], (D_MODEL, N_HEADS * D_K), D_MODEL),
        "wk2": init(ks[5], (D_MODEL, N_HEADS * D_K), D_MODEL),
        "wv2": init(ks[6], (D_MODEL, N_HEADS * D_V), D_MODEL),
        "fc2": init(ks[7], (N_HEADS * D_V, D_MODEL), N_HEADS * D_V),
        # position-wise FFN + layernorm (biases / affine kept 2D: (1, dim))
        "w1": init(ks[8], (D_MODEL, D_FFN), D_MODEL),
        "b1": init(ks[9], (1, D_FFN), D_MODEL),
        "w2": init(ks[10], (D_FFN, D_MODEL), D_FFN),
        "b2": init(ks[11], (1, D_MODEL), D_FFN),
        "gamma": jnp.ones((1, D_MODEL), jnp.float32),
        "beta": jnp.zeros((1, D_MODEL), jnp.float32),
    }

    dec_input = jax.random.normal(ks[12], (B, T, D_MODEL), jnp.float32)
    enc_output = jax.random.normal(ks[13], (B, T, D_MODEL), jnp.float32)
    # causal mask for self-attention, all-ones (no masking) for enc-attention
    slf_mask = jnp.tril(jnp.ones((T, T), jnp.float32))[None].repeat(B, axis=0)
    enc_mask = jnp.ones((B, T, T), jnp.float32)

    fn = jax.jit(functools.partial(transformer_decoder_layer, params=params))
    dec_out, slf_attn, enc_attn = fn(dec_input, enc_output, slf_mask, enc_mask)
    jax.block_until_ready((dec_out, slf_attn, enc_attn))

    ref_out, ref_slf, ref_enc = reference_forward(
        dec_input, enc_output, slf_mask, enc_mask, params)

    assert jnp.allclose(dec_out, ref_out, atol=1e-4, rtol=1e-4), "dec_output mismatch"
    assert jnp.allclose(slf_attn, ref_slf, atol=1e-5, rtol=1e-4), "slf_attn mismatch"
    assert jnp.allclose(enc_attn, ref_enc, atol=1e-5, rtol=1e-4), "enc_attn mismatch"

    print("KERNEL_OK")
</pallas_src>

<mosaic_0001>
module attributes {stable_mosaic.version = 11 : i64} {
  func.func @decoder_layer_kernel(%arg0: memref<16x32xf32, #tpu.memory_space<vmem>>, %arg1: memref<16x32xf32, #tpu.memory_space<vmem>>, %arg2: memref<16x16xf32, #tpu.memory_space<vmem>>, %arg3: memref<16x16xf32, #tpu.memory_space<vmem>>, %arg4: memref<32x32xf32, #tpu.memory_space<vmem>>, %arg5: memref<32x32xf32, #tpu.memory_space<vmem>>, %arg6: memref<32x32xf32, #tpu.memory_space<vmem>>, %arg7: memref<32x32xf32, #tpu.memory_space<vmem>>, %arg8: memref<32x32xf32, #tpu.memory_space<vmem>>, %arg9: memref<32x32xf32, #tpu.memory_space<vmem>>, %arg10: memref<32x32xf32, #tpu.memory_space<vmem>>, %arg11: memref<32x32xf32, #tpu.memory_space<vmem>>, %arg12: memref<32x64xf32, #tpu.memory_space<vmem>>, %arg13: memref<1x64xf32, #tpu.memory_space<vmem>>, %arg14: memref<64x32xf32, #tpu.memory_space<vmem>>, %arg15: memref<1x32xf32, #tpu.memory_space<vmem>>, %arg16: memref<1x32xf32, #tpu.memory_space<vmem>>, %arg17: memref<1x32xf32, #tpu.memory_space<vmem>>, %arg18: memref<16x32xf32, #tpu.memory_space<vmem>>, %arg19: memref<2x16x16xf32, #tpu.memory_space<vmem>>, %arg20: memref<2x16x16xf32, #tpu.memory_space<vmem>>) attributes {dimension_semantics = [], scalar_prefetch = 0 : i64, scratch_operands = 0 : i64, tpu.core_type = #tpu.core_type<tc>} {
    %c0 = arith.constant 0 : index
    %c0_0 = arith.constant 0 : index
    %0 = vector.load %arg0[%c0, %c0_0] : memref<16x32xf32, #tpu.memory_space<vmem>>, vector<16x32xf32>
    %c0_1 = arith.constant 0 : index
    %c0_2 = arith.constant 0 : index
    %1 = vector.load %arg1[%c0_1, %c0_2] : memref<16x32xf32, #tpu.memory_space<vmem>>, vector<16x32xf32>
    %c0_3 = arith.constant 0 : index
    %c0_4 = arith.constant 0 : index
    %2 = vector.load %arg2[%c0_3, %c0_4] : memref<16x16xf32, #tpu.memory_space<vmem>>, vector<16x16xf32>
    %cst = arith.constant 0.000000e+00 : f32
    %3 = vector.broadcast %cst : f32 to vector<16x16xf32>
    %4 = arith.cmpf oeq, %2, %3 : vector<16x16xf32>
    %cst_5 = arith.constant -1.000000e+09 : f32
    %cst_6 = arith.constant 0.000000e+00 : f32
    %5 = vector.broadcast %cst_5 : f32 to vector<16x16xf32>
    %6 = vector.broadcast %cst_6 : f32 to vector<16x16xf32>
    %7 = arith.select %4, %5, %6 : vector<16x16xi1>, vector<16x16xf32>
    %cst_7 = arith.constant 0.000000e+00 : f32
    %8 = vector.broadcast %cst_7 : f32 to vector<16x32xf32>
    %c0_8 = arith.constant 0 : index
    %c0_9 = arith.constant 0 : index
    %9 = vector.load %arg4[%c0_8, %c0_9] : memref<32x32xf32, #tpu.memory_space<vmem>>, vector<32x16xf32>
    %cst_10 = arith.constant dense<0.000000e+00> : vector<16x16xf32>
    %10 = tpu.matmul %0, %9, %cst_10 {dimension_numbers = #tpu.dot_dimension_numbers<[1], [0], [0], [1], [0, 0, 1, 1], [], []>} : vector<16x32xf32>, vector<32x16xf32>, vector<16x16xf32> -> vector<16x16xf32>
    %c0_11 = arith.constant 0 : index
    %c0_12 = arith.constant 0 : index
    %11 = vector.load %arg5[%c0_11, %c0_12] : memref<32x32xf32, #tpu.memory_space<vmem>>, vector<32x16xf32>
    %cst_13 = arith.constant dense<0.000000e+00> : vector<16x16xf32>
    %12 = tpu.matmul %0, %11, %cst_13 {dimension_numbers = #tpu.dot_dimension_numbers<[1], [0], [0], [1], [0, 0, 1, 1], [], []>} : vector<16x32xf32>, vector<32x16xf32>, vector<16x16xf32> -> vector<16x16xf32>
    %c0_14 = arith.constant 0 : index
    %c0_15 = arith.constant 0 : index
    %13 = vector.load %arg6[%c0_14, %c0_15] : memref<32x32xf32, #tpu.memory_space<vmem>>, vector<32x16xf32>
    %cst_16 = arith.constant dense<0.000000e+00> : vector<16x16xf32>
    %14 = tpu.matmul %0, %13, %cst_16 {dimension_numbers = #tpu.dot_dimension_numbers<[1], [0], [0], [1], [0, 0, 1, 1], [], []>} : vector<16x32xf32>, vector<32x16xf32>, vector<16x16xf32> -> vector<16x16xf32>
    %cst_17 = arith.constant dense<0.000000e+00> : vector<16x16xf32>
    %15 = tpu.matmul %10, %12, %cst_17 {dimension_numbers = #tpu.dot_dimension_numbers<[1], [1], [0], [0], [0, 0, 1, 0], [], []>} : vector<16x16xf32>, vector<16x16xf32>, vector<16x16xf32> -> vector<16x16xf32>
    %cst_18 = arith.constant 2.500000e-01 : f32
    %16 = vector.broadcast %cst_18 : f32 to vector<16x16xf32>
    %17 = arith.mulf %15, %16 : vector<16x16xf32>
    %18 = arith.addf %17, %7 : vector<16x16xf32>
    %cst_19 = arith.constant dense<0xFF800000> : vector<16xf32>
    %19 = vector.multi_reduction <maximumf>, %18, %cst_19 [1] : vector<16x16xf32> to vector<16xf32>
    %20 = vector.shape_cast %19 : vector<16xf32> to vector<16x1xf32>
    %21 = vector.broadcast %20 : vector<16x1xf32> to vector<16x16xf32>
    %22 = arith.subf %18, %21 : vector<16x16xf32>
    %23 = math.exp %22 : vector<16x16xf32>
    %cst_20 = arith.constant dense<0.000000e+00> : vector<16xf32>
    %24 = vector.multi_reduction <add>, %23, %cst_20 [1] : vector<16x16xf32> to vector<16xf32>
    %25 = vector.shape_cast %24 : vector<16xf32> to vector<16x1xf32>
    %26 = tpu.reciprocal %25 : vector<16x1xf32> -> vector<16x1xf32>
    %27 = vector.broadcast %26 : vector<16x1xf32> to vector<16x16xf32>
    %28 = arith.mulf %23, %27 : vector<16x16xf32>
    %c0_21 = arith.constant 0 : index
    %c0_22 = arith.constant 0 : index
    %c0_23 = arith.constant 0 : index
    %29 = vector.load %arg19[%c0_21, %c0_22, %c0_23] : memref<2x16x16xf32, #tpu.memory_space<vmem>>, vector<1x16x16xf32>
    %30 = vector.shape_cast %29 : vector<1x16x16xf32> to vector<16x16xf32>
    %31 = vector.shape_cast %28 : vector<16x16xf32> to vector<1x16x16xf32>
    tpu.vector_store %arg19[%c0_21, %c0_22, %c0_23], %31 {strides = array<i32>} : memref<2x16x16xf32, #tpu.memory_space<vmem>>, vector<1x16x16xf32>,
    %cst_24 = arith.constant dense<0.000000e+00> : vector<16x16xf32>
    %32 = tpu.matmul %28, %14, %cst_24 {dimension_numbers = #tpu.dot_dimension_numbers<[1], [0], [0], [1], [0, 0, 1, 1], [], []>} : vector<16x16xf32>, vector<16x16xf32>, vector<16x16xf32> -> vector<16x16xf32>
    %c0_25 = arith.constant 0 : index
    %c0_26 = arith.constant 0 : index
    %33 = vector.load %arg7[%c0_25, %c0_26] : memref<32x32xf32, #tpu.memory_space<vmem>>, vector<16x32xf32>
    %cst_27 = arith.constant dense<0.000000e+00> : vector<16x32xf32>
    %34 = tpu.matmul %32, %33, %cst_27 {dimension_numbers = #tpu.dot_dimension_numbers<[1], [0], [0], [1], [0, 0, 1, 1], [], []>} : vector<16x16xf32>, vector<16x32xf32>, vector<16x32xf32> -> vector<16x32xf32>
    %35 = arith.addf %8, %34 : vector<16x32xf32>
    %c0_28 = arith.constant 0 : index
    %c16 = arith.constant 16 : index
    %36 = vector.load %arg4[%c0_28, %c16] : memref<32x32xf32, #tpu.memory_space<vmem>>, vector<32x16xf32>
    %cst_29 = arith.constant dense<0.000000e+00> : vector<16x16xf32>
    %37 = tpu.matmul %0, %36, %cst_29 {dimension_numbers = #tpu.dot_dimension_numbers<[1], [0], [0], [1], [0, 0, 1, 1], [], []>} : vector<16x32xf32>, vector<32x16xf32>, vector<16x16xf32> -> vector<16x16xf32>
    %c0_30 = arith.constant 0 : index
    %c16_31 = arith.constant 16 : index
    %38 = vector.load %arg5[%c0_30, %c16_31] : memref<32x32xf32, #tpu.memory_space<vmem>>, vector<32x16xf32>
    %cst_32 = arith.constant dense<0.000000e+00> : vector<16x16xf32>
    %39 = tpu.matmul %0, %38, %cst_32 {dimension_numbers = #tpu.dot_dimension_numbers<[1], [0], [0], [1], [0, 0, 1, 1], [], []>} : vector<16x32xf32>, vector<32x16xf32>, vector<16x16xf32> -> vector<16x16xf32>
    %c0_33 = arith.constant 0 : index
    %c16_34 = arith.constant 16 : index
    %40 = vector.load %arg6[%c0_33, %c16_34] : memref<32x32xf32, #tpu.memory_space<vmem>>, vector<32x16xf32>
    %cst_35 = arith.constant dense<0.000000e+00> : vector<16x16xf32>
    %41 = tpu.matmul %0, %40, %cst_35 {dimension_numbers = #tpu.dot_dimension_numbers<[1], [0], [0], [1], [0, 0, 1, 1], [], []>} : vector<16x32xf32>, vector<32x16xf32>, vector<16x16xf32> -> vector<16x16xf32>
    %cst_36 = arith.constant dense<0.000000e+00> : vector<16x16xf32>
    %42 = tpu.matmul %37, %39, %cst_36 {dimension_numbers = #tpu.dot_dimension_numbers<[1], [1], [0], [0], [0, 0, 1, 0], [], []>} : vector<16x16xf32>, vector<16x16xf32>, vector<16x16xf32> -> vector<16x16xf32>
    %cst_37 = arith.constant 2.500000e-01 : f32
    %43 = vector.broadcast %cst_37 : f32 to vector<16x16xf32>
    %44 = arith.mulf %42, %43 : vector<16x16xf32>
    %45 = arith.addf %44, %7 : vector<16x16xf32>
    %cst_38 = arith.constant dense<0xFF800000> : vector<16xf32>
    %46 = vector.multi_reduction <maximumf>, %45, %cst_38 [1] : vector<16x16xf32> to vector<16xf32>
    %47 = vector.shape_cast %46 : vector<16xf32> to vector<16x1xf32>
    %48 = vector.broadcast %47 : vector<16x1xf32> to vector<16x16xf32>
    %49 = arith.subf %45, %48 : vector<16x16xf32>
    %50 = math.exp %49 : vector<16x16xf32>
    %cst_39 = arith.constant dense<0.000000e+00> : vector<16xf32>
    %51 = vector.multi_reduction <add>, %50, %cst_39 [1] : vector<16x16xf32> to vector<16xf32>
    %52 = vector.shape_cast %51 : vector<16xf32> to vector<16x1xf32>
    %53 = tpu.reciprocal %52 : vector<16x1xf32> -> vector<16x1xf32>
    %54 = vector.broadcast %53 : vector<16x1xf32> to vector<16x16xf32>
    %55 = arith.mulf %50, %54 : vector<16x16xf32>
    %c1 = arith.constant 1 : index
    %c0_40 = arith.constant 0 : index
    %c0_41 = arith.constant 0 : index
    %56 = vector.load %arg19[%c1, %c0_40, %c0_41] : memref<2x16x16xf32, #tpu.memory_space<vmem>>, vector<1x16x16xf32>
    %57 = vector.shape_cast %56 : vector<1x16x16xf32> to vector<16x16xf32>
    %58 = vector.shape_cast %55 : vector<16x16xf32> to vector<1x16x16xf32>
    tpu.vector_store %arg19[%c1, %c0_40, %c0_41], %58 {strides = array<i32>} : memref<2x16x16xf32, #tpu.memory_space<vmem>>, vector<1x16x16xf32>,
    %cst_42 = arith.constant dense<0.000000e+00> : vector<16x16xf32>
    %59 = tpu.matmul %55, %41, %cst_42 {dimension_numbers = #tpu.dot_dimension_numbers<[1], [0], [0], [1], [0, 0, 1, 1], [], []>} : vector<16x16xf32>, vector<16x16xf32>, vector<16x16xf32> -> vector<16x16xf32>
    %c16_43 = arith.constant 16 : index
    %c0_44 = arith.constant 0 : index
    %60 = vector.load %arg7[%c16_43, %c0_44] : memref<32x32xf32, #tpu.memory_space<vmem>>, vector<16x32xf32>
    %cst_45 = arith.constant dense<0.000000e+00> : vector<16x32xf32>
    %61 = tpu.matmul %59, %60, %cst_45 {dimension_numbers = #tpu.dot_dimension_numbers<[1], [0], [0], [1], [0, 0, 1, 1], [], []>} : vector<16x16xf32>, vector<16x32xf32>, vector<16x32xf32> -> vector<16x32xf32>
    %62 = arith.addf %35, %61 : vector<16x32xf32>
    %c0_46 = arith.constant 0 : index
    %c0_47 = arith.constant 0 : index
    %63 = vector.load %arg3[%c0_46, %c0_47] : memref<16x16xf32, #tpu.memory_space<vmem>>, vector<16x16xf32>
    %cst_48 = arith.constant 0.000000e+00 : f32
    %64 = vector.broadcast %cst_48 : f32 to vector<16x16xf32>
    %65 = arith.cmpf oeq, %63, %64 : vector<16x16xf32>
    %cst_49 = arith.constant -1.000000e+09 : f32
    %cst_50 = arith.constant 0.000000e+00 : f32
    %66 = vector.broadcast %cst_49 : f32 to vector<16x16xf32>
    %67 = vector.broadcast %cst_50 : f32 to vector<16x16xf32>
    %68 = arith.select %65, %66, %67 : vector<16x16xi1>, vector<16x16xf32>
    %cst_51 = arith.constant 0.000000e+00 : f32
    %69 = vector.broadcast %cst_51 : f32 to vector<16x32xf32>
    %c0_52 = arith.constant 0 : index
    %c0_53 = arith.constant 0 : index
    %70 = vector.load %arg8[%c0_52, %c0_53] : memref<32x32xf32, #tpu.memory_space<vmem>>, vector<32x16xf32>
    %cst_54 = arith.constant dense<0.000000e+00> : vector<16x16xf32>
    %71 = tpu.matmul %62, %70, %cst_54 {dimension_numbers = #tpu.dot_dimension_numbers<[1], [0], [0], [1], [0, 0, 1, 1], [], []>} : vector<16x32xf32>, vector<32x16xf32>, vector<16x16xf32> -> vector<16x16xf32>
    %c0_55 = arith.constant 0 : index
    %c0_56 = arith.constant 0 : index
    %72 = vector.load %arg9[%c0_55, %c0_56] : memref<32x32xf32, #tpu.memory_space<vmem>>, vector<32x16xf32>
    %cst_57 = arith.constant dense<0.000000e+00> : vector<16x16xf32>
    %73 = tpu.matmul %1, %72, %cst_57 {dimension_numbers = #tpu.dot_dimension_numbers<[1], [0], [0], [1], [0, 0, 1, 1], [], []>} : vector<16x32xf32>, vector<32x16xf32>, vector<16x16xf32> -> vector<16x16xf32>
    %c0_58 = arith.constant 0 : index
    %c0_59 = arith.constant 0 : index
    %74 = vector.load %arg10[%c0_58, %c0_59] : memref<32x32xf32, #tpu.memory_space<vmem>>, vector<32x16xf32>
    %cst_60 = arith.constant dense<0.000000e+00> : vector<16x16xf32>
    %75 = tpu.matmul %1, %74, %cst_60 {dimension_numbers = #tpu.dot_dimension_numbers<[1], [0], [0], [1], [0, 0, 1, 1], [], []>} : vector<16x32xf32>, vector<32x16xf32>, vector<16x16xf32> -> vector<16x16xf32>
    %cst_61 = arith.constant dense<0.000000e+00> : vector<16x16xf32>
    %76 = tpu.matmul %71, %73, %cst_61 {dimension_numbers = #tpu.dot_dimension_numbers<[1], [1], [0], [0], [0, 0, 1, 0], [], []>} : vector<16x16xf32>, vector<16x16xf32>, vector<16x16xf32> -> vector<16x16xf32>
    %cst_62 = arith.constant 2.500000e-01 : f32
    %77 = vector.broadcast %cst_62 : f32 to vector<16x16xf32>
    %78 = arith.mulf %76, %77 : vector<16x16xf32>
    %79 = arith.addf %78, %68 : vector<16x16xf32>
    %cst_63 = arith.constant dense<0xFF800000> : vector<16xf32>
    %80 = vector.multi_reduction <maximumf>, %79, %cst_63 [1] : vector<16x16xf32> to vector<16xf32>
    %81 = vector.shape_cast %80 : vector<16xf32> to vector<16x1xf32>
    %82 = vector.broadcast %81 : vector<16x1xf32> to vector<16x16xf32>
    %83 = arith.subf %79, %82 : vector<16x16xf32>
    %84 = math.exp %83 : vector<16x16xf32>
    %cst_64 = arith.constant dense<0.000000e+00> : vector<16xf32>
    %85 = vector.multi_reduction <add>, %84, %cst_64 [1] : vector<16x16xf32> to vector<16xf32>
    %86 = vector.shape_cast %85 : vector<16xf32> to vector<16x1xf32>
    %87 = tpu.reciprocal %86 : vector<16x1xf32> -> vector<16x1xf32>
    %88 = vector.broadcast %87 : vector<16x1xf32> to vector<16x16xf32>
    %89 = arith.mulf %84, %88 : vector<16x16xf32>
    %c0_65 = arith.constant 0 : index
    %c0_66 = arith.constant 0 : index
    %c0_67 = arith.constant 0 : index
    %90 = vector.load %arg20[%c0_65, %c0_66, %c0_67] : memref<2x16x16xf32, #tpu.memory_space<vmem>>, vector<1x16x16xf32>
    %91 = vector.shape_cast %90 : vector<1x16x16xf32> to vector<16x16xf32>
    %92 = vector.shape_cast %89 : vector<16x16xf32> to vector<1x16x16xf32>
    tpu.vector_store %arg20[%c0_65, %c0_66, %c0_67], %92 {strides = array<i32>} : memref<2x16x16xf32, #tpu.memory_space<vmem>>, vector<1x16x16xf32>,
    %cst_68 = arith.constant dense<0.000000e+00> : vector<16x16xf32>
    %93 = tpu.matmul %89, %75, %cst_68 {dimension_numbers = #tpu.dot_dimension_numbers<[1], [0], [0], [1], [0, 0, 1, 1], [], []>} : vector<16x16xf32>, vector<16x16xf32>, vector<16x16xf32> -> vector<16x16xf32>
    %c0_69 = arith.constant 0 : index
    %c0_70 = arith.constant 0 : index
    %94 = vector.load %arg11[%c0_69, %c0_70] : memref<32x32xf32, #tpu.memory_space<vmem>>, vector<16x32xf32>
    %cst_71 = arith.constant dense<0.000000e+00> : vector<16x32xf32>
    %95 = tpu.matmul %93, %94, %cst_71 {dimension_numbers = #tpu.dot_dimension_numbers<[1], [0], [0], [1], [0, 0, 1, 1], [], []>} : vector<16x16xf32>, vector<16x32xf32>, vector<16x32xf32> -> vector<16x32xf32>
    %96 = arith.addf %69, %95 : vector<16x32xf32>
    %c0_72 = arith.constant 0 : index
    %c16_73 = arith.constant 16 : index
    %97 = vector.load %arg8[%c0_72, %c16_73] : memref<32x32xf32, #tpu.memory_space<vmem>>, vector<32x16xf32>
    %cst_74 = arith.constant dense<0.000000e+00> : vector<16x16xf32>
    %98 = tpu.matmul %62, %97, %cst_74 {dimension_numbers = #tpu.dot_dimension_numbers<[1], [0], [0], [1], [0, 0, 1, 1], [], []>} : vector<16x32xf32>, vector<32x16xf32>, vector<16x16xf32> -> vector<16x16xf32>
    %c0_75 = arith.constant 0 : index
    %c16_76 = arith.constant 16 : index
    %99 = vector.load %arg9[%c0_75, %c16_76] : memref<32x32xf32, #tpu.memory_space<vmem>>, vector<32x16xf32>
    %cst_77 = arith.constant dense<0.000000e+00> : vector<16x16xf32>
    %100 = tpu.matmul %1, %99, %cst_77 {dimension_numbers = #tpu.dot_dimension_numbers<[1], [0], [0], [1], [0, 0, 1, 1], [], []>} : vector<16x32xf32>, vector<32x16xf32>, vector<16x16xf32> -> vector<16x16xf32>
    %c0_78 = arith.constant 0 : index
    %c16_79 = arith.constant 16 : index
    %101 = vector.load %arg10[%c0_78, %c16_79] : memref<32x32xf32, #tpu.memory_space<vmem>>, vector<32x16xf32>
    %cst_80 = arith.constant dense<0.000000e+00> : vector<16x16xf32>
    %102 = tpu.matmul %1, %101, %cst_80 {dimension_numbers = #tpu.dot_dimension_numbers<[1], [0], [0], [1], [0, 0, 1, 1], [], []>} : vector<16x32xf32>, vector<32x16xf32>, vector<16x16xf32> -> vector<16x16xf32>
    %cst_81 = arith.constant dense<0.000000e+00> : vector<16x16xf32>
    %103 = tpu.matmul %98, %100, %cst_81 {dimension_numbers = #tpu.dot_dimension_numbers<[1], [1], [0], [0], [0, 0, 1, 0], [], []>} : vector<16x16xf32>, vector<16x16xf32>, vector<16x16xf32> -> vector<16x16xf32>
    %cst_82 = arith.constant 2.500000e-01 : f32
    %104 = vector.broadcast %cst_82 : f32 to vector<16x16xf32>
    %105 = arith.mulf %103, %104 : vector<16x16xf32>
    %106 = arith.addf %105, %68 : vector<16x16xf32>
    %cst_83 = arith.constant dense<0xFF800000> : vector<16xf32>
    %107 = vector.multi_reduction <maximumf>, %106, %cst_83 [1] : vector<16x16xf32> to vector<16xf32>
    %108 = vector.shape_cast %107 : vector<16xf32> to vector<16x1xf32>
    %109 = vector.broadcast %108 : vector<16x1xf32> to vector<16x16xf32>
    %110 = arith.subf %106, %109 : vector<16x16xf32>
    %111 = math.exp %110 : vector<16x16xf32>
    %cst_84 = arith.constant dense<0.000000e+00> : vector<16xf32>
    %112 = vector.multi_reduction <add>, %111, %cst_84 [1] : vector<16x16xf32> to vector<16xf32>
    %113 = vector.shape_cast %112 : vector<16xf32> to vector<16x1xf32>
    %114 = tpu.reciprocal %113 : vector<16x1xf32> -> vector<16x1xf32>
    %115 = vector.broadcast %114 : vector<16x1xf32> to vector<16x16xf32>
    %116 = arith.mulf %111, %115 : vector<16x16xf32>
    %c1_85 = arith.constant 1 : index
    %c0_86 = arith.constant 0 : index
    %c0_87 = arith.constant 0 : index
    %117 = vector.load %arg20[%c1_85, %c0_86, %c0_87] : memref<2x16x16xf32, #tpu.memory_space<vmem>>, vector<1x16x16xf32>
    %118 = vector.shape_cast %117 : vector<1x16x16xf32> to vector<16x16xf32>
    %119 = vector.shape_cast %116 : vector<16x16xf32> to vector<1x16x16xf32>
    tpu.vector_store %arg20[%c1_85, %c0_86, %c0_87], %119 {strides = array<i32>} : memref<2x16x16xf32, #tpu.memory_space<vmem>>, vector<1x16x16xf32>,
    %cst_88 = arith.constant dense<0.000000e+00> : vector<16x16xf32>
    %120 = tpu.matmul %116, %102, %cst_88 {dimension_numbers = #tpu.dot_dimension_numbers<[1], [0], [0], [1], [0, 0, 1, 1], [], []>} : vector<16x16xf32>, vector<16x16xf32>, vector<16x16xf32> -> vector<16x16xf32>
    %c16_89 = arith.constant 16 : index
    %c0_90 = arith.constant 0 : index
    %121 = vector.load %arg11[%c16_89, %c0_90] : memref<32x32xf32, #tpu.memory_space<vmem>>, vector<16x32xf32>
    %cst_91 = arith.constant dense<0.000000e+00> : vector<16x32xf32>
    %122 = tpu.matmul %120, %121, %cst_91 {dimension_numbers = #tpu.dot_dimension_numbers<[1], [0], [0], [1], [0, 0, 1, 1], [], []>} : vector<16x16xf32>, vector<16x32xf32>, vector<16x32xf32> -> vector<16x32xf32>
    %123 = arith.addf %96, %122 : vector<16x32xf32>
    %c0_92 = arith.constant 0 : index
    %c0_93 = arith.constant 0 : index
    %124 = vector.load %arg12[%c0_92, %c0_93] : memref<32x64xf32, #tpu.memory_space<vmem>>, vector<32x64xf32>
    %cst_94 = arith.constant dense<0.000000e+00> : vector<16x64xf32>
    %125 = tpu.matmul %123, %124, %cst_94 {dimension_numbers = #tpu.dot_dimension_numbers<[1], [0], [0], [1], [0, 0, 1, 1], [], []>} : vector<16x32xf32>, vector<32x64xf32>, vector<16x64xf32> -> vector<16x64xf32>
    %c0_95 = arith.constant 0 : index
    %c0_96 = arith.constant 0 : index
    %126 = vector.load %arg13[%c0_95, %c0_96] : memref<1x64xf32, #tpu.memory_space<vmem>>, vector<1x64xf32>
    %127 = vector.broadcast %126 : vector<1x64xf32> to vector<16x64xf32>
    %128 = arith.addf %125, %127 : vector<16x64xf32>
    %cst_97 = arith.constant 0.000000e+00 : f32
    %129 = vector.broadcast %cst_97 : f32 to vector<16x64xf32>
    %130 = arith.maximumf %128, %129 : vector<16x64xf32>
    %c0_98 = arith.constant 0 : index
    %c0_99 = arith.constant 0 : index
    %131 = vector.load %arg14[%c0_98, %c0_99] : memref<64x32xf32, #tpu.memory_space<vmem>>, vector<64x32xf32>
    %cst_100 = arith.constant dense<0.000000e+00> : vector<16x32xf32>
    %132 = tpu.matmul %130, %131, %cst_100 {dimension_numbers = #tpu.dot_dimension_numbers<[1], [0], [0], [1], [0, 0, 1, 1], [], []>} : vector<16x64xf32>, vector<64x32xf32>, vector<16x32xf32> -> vector<16x32xf32>
    %c0_101 = arith.constant 0 : index
    %c0_102 = arith.constant 0 : index
    %133 = vector.load %arg15[%c0_101, %c0_102] : memref<1x32xf32, #tpu.memory_space<vmem>>, vector<1x32xf32>
    %134 = vector.broadcast %133 : vector<1x32xf32> to vector<16x32xf32>
    %135 = arith.addf %132, %134 : vector<16x32xf32>
    %136 = arith.addf %135, %123 : vector<16x32xf32>
    %cst_103 = arith.constant dense<0.000000e+00> : vector<16xf32>
    %137 = vector.multi_reduction <add>, %136, %cst_103 [1] : vector<16x32xf32> to vector<16xf32>
    %138 = vector.shape_cast %137 : vector<16xf32> to vector<16x1xf32>
    %cst_104 = arith.constant 3.200000e+01 : f32
    %139 = vector.broadcast %cst_104 : f32 to vector<16x1xf32>
    %140 = arith.divf %138, %139 : vector<16x1xf32>
    %141 = vector.broadcast %140 : vector<16x1xf32> to vector<16x32xf32>
    %142 = arith.subf %136, %141 : vector<16x32xf32>
    %143 = arith.mulf %142, %142 : vector<16x32xf32>
    %cst_105 = arith.constant dense<0.000000e+00> : vector<16xf32>
    %144 = vector.multi_reduction <add>, %143, %cst_105 [1] : vector<16x32xf32> to vector<16xf32>
    %145 = vector.shape_cast %144 : vector<16xf32> to vector<16x1xf32>
    %cst_106 = arith.constant 3.200000e+01 : f32
    %146 = vector.broadcast %cst_106 : f32 to vector<16x1xf32>
    %147 = arith.divf %145, %146 : vector<16x1xf32>
    %cst_107 = arith.constant 9.99999997E-7 : f32
    %148 = vector.broadcast %cst_107 : f32 to vector<16x1xf32>
    %149 = arith.addf %147, %148 : vector<16x1xf32>
    %150 = math.rsqrt %149 : vector<16x1xf32>
    %151 = vector.broadcast %150 : vector<16x1xf32> to vector<16x32xf32>
    %152 = arith.mulf %142, %151 : vector<16x32xf32>
    %c0_108 = arith.constant 0 : index
    %c0_109 = arith.constant 0 : index
    %153 = vector.load %arg16[%c0_108, %c0_109] : memref<1x32xf32, #tpu.memory_space<vmem>>, vector<1x32xf32>
    %154 = vector.broadcast %153 : vector<1x32xf32> to vector<16x32xf32>
    %155 = arith.mulf %152, %154 : vector<16x32xf32>
    %c0_110 = arith.constant 0 : index
    %c0_111 = arith.constant 0 : index
    %156 = vector.load %arg17[%c0_110, %c0_111] : memref<1x32xf32, #tpu.memory_space<vmem>>, vector<1x32xf32>
    %157 = vector.broadcast %156 : vector<1x32xf32> to vector<16x32xf32>
    %158 = arith.addf %155, %157 : vector<16x32xf32>
    %c0_112 = arith.constant 0 : index
    %c0_113 = arith.constant 0 : index
    %159 = vector.load %arg18[%c0_112, %c0_113] : memref<16x32xf32, #tpu.memory_space<vmem>>, vector<16x32xf32>
    tpu.vector_store %arg18[%c0_112, %c0_113], %158 {strides = array<i32>} : memref<16x32xf32, #tpu.memory_space<vmem>>, vector<16x32xf32>,
    return
  }
}

</mosaic_0001>

<bundles_post_ra>
// kernel: transformer_decoder_layer.1
= control target key start
LH: loop header
LB: loop body
LE: loop exit
PB: predicated region body
PF: predicated region fallthrough
CT: control target
= control target key end

     0   :  { %s2243_s0 = inlined_call_operand.hbm [shape: f32[16,32], index: 0, kind: input, shape index: {}]   ;;  %s2244_s1 = inlined_call_operand.hbm [shape: f32[16,32], index: 1, kind: input, shape index: {}]   ;;  %s2245_s2 = inlined_call_operand.vmem [shape: f32[16,16], index: 2, kind: input, shape index: {}]   ;;  %s2246_s3 = inlined_call_operand.vmem [shape: f32[16,16], index: 3, kind: input, shape index: {}]   ;;  %s2247_s4 = inlined_call_operand.hbm [shape: f32[32,32], index: 4, kind: input, shape index: {}]   ;;  %s2248_s5 = inlined_call_operand.hbm [shape: f32[32,32], index: 5, kind: input, shape index: {}]   ;;  %s2249_s6 = inlined_call_operand.hbm [shape: f32[32,32], index: 6, kind: input, shape index: {}]   ;;  %s2250_s7 = inlined_call_operand.hbm [shape: f32[32,32], index: 7, kind: input, shape index: {}]   ;;  %s2251_s8 = inlined_call_operand.hbm [shape: f32[32,32], index: 8, kind: input, shape index: {}]   ;;  %s2252_s9 = inlined_call_operand.vmem [shape: f32[32,32], index: 9, kind: input, shape index: {}]   ;;  %s2253_s10 = inlined_call_operand.vmem [shape: f32[32,32], index: 10, kind: input, shape index: {}]   ;;  %s2254_s11 = inlined_call_operand.vmem [shape: f32[32,32], index: 11, kind: input, shape index: {}]   ;;  %s2255_s12 = inlined_call_operand.vmem [shape: f32[32,64], index: 12, kind: input, shape index: {}]   ;;  %s2256_s13 = inlined_call_operand.vmem [shape: f32[1,64], index: 13, kind: input, shape index: {}]   ;;  %s2257_s14 = inlined_call_operand.vmem [shape: f32[64,32], index: 14, kind: input, shape index: {}]   ;;  %s2258_s15 = inlined_call_operand.vmem [shape: f32[1,32], index: 15, kind: input, shape index: {}]   ;;  %s2259_s16 = inlined_call_operand.vmem [shape: f32[1,32], index: 16, kind: input, shape index: {}]   ;;  %s2260_s17 = inlined_call_operand.vmem [shape: f32[1,32], index: 17, kind: input, shape index: {}]   ;;  %s2261_s18 = inlined_call_operand.hbm [shape: f32[16,32], index: 18, kind: output, shape index: {0}]   ;;  %s2262_s19 = inlined_call_operand.vmem [shape: f32[2,16,16], index: 19, kind: output, shape index: {1}]   ;;  %s2263_s20 = inlined_call_operand.vmem [shape: f32[2,16,16], index: 20, kind: output, shape index: {2}]  }
   0x1   :  { %2266 = sst [smem:[#allocation20_spill]] %s2243_s0 }
   0x2   :  { %2267 = sst [smem:[#allocation21_spill]] %s2244_s1 }
   0x3   :  { %2268 = sst [smem:[#allocation22_spill]] %s2245_s2 }
   0x4   :  { %2269 = sst [smem:[#allocation23_spill]] %s2246_s3 }
   0x5   :  { %2270 = sst [smem:[#allocation24_spill]] %s2247_s4 }
   0x6   :  { %26 = vsyncpa [#allocation3], 0 }
   0x7   :  { %27 = vsyncpa [#allocation6], 0 }
   0x8   :  { %28 = vsyncpa [#allocation9], 0 }
   0x9   :  { %29 = vsyncpa [#allocation12], 0 }
   0xa   :  { %30 = vsyncpa [#allocation4], 0  ;;  %s2271_s23 = sld [smem:[#allocation21_spill]]  ;;  %s1793_s2 = smov [#allocation5]  }
   0xb   :  { %s50_s25 = sshll.u32 %s1793_s2, 4  ;;  %s78_s27 = sshll.u32 %s2248_s5, 4  ;;  %s51_s25 = int_to_ptr.vmem [resolvable:$true] %s50_s25  ;;  %s79_s27 = int_to_ptr.hbm [resolvable:$true] %s78_s27 }
   0xc   :  { %s1794_s28 = smov 128   ;;  %s1795_s4 = smov 8  }
   0xd   :  { %s1796_s29 = smov [#allocation8]   ;;  %s104_s1 = sshll.u32 %s2250_s7, 4  ;;  %s105_s1 = int_to_ptr.hbm [resolvable:$true] %s104_s1 }
   0xe   :  { %s80_s30 = sshll.u32 %s1796_s29, 4  ;;  %s1797_s3 = smov [#allocation11]   ;;  %s81_s30 = int_to_ptr.vmem [resolvable:$true] %s80_s30 }
   0xf   :  { %86 = dma.hbm_to_vmem [thread:$0]  %s79_s27, 512, %s81_s30, [#allocation9], %s1794_s28, %s1794_s28, %s1795_s4  }
  0x10   :  { %s48_s24 = sshll.u32 %s2271_s23, 4  ;;  %s2272_s23 = sld [smem:[#allocation20_spill]]  ;;  %s49_s24 = int_to_ptr.hbm [resolvable:$true] %s48_s24 }
  0x11   :  { %56 = dma.hbm_to_vmem [thread:$0]  %s49_s24, 256, %s51_s25, [#allocation6], %s1794_s28, %s1794_s28, %s1795_s4  }
  0x12   :  { %s106_s26 = sshll.u32 %s1797_s3, 4  ;;  %s1798_s24 = smov [#allocation2]   ;;  %s107_s26 = int_to_ptr.vmem [resolvable:$true] %s106_s26 }
  0x13   :  { %112 = dma.hbm_to_vmem [thread:$0]  %s105_s1, 512, %s107_s26, [#allocation12], %s1794_s28, %s1794_s28, %s1795_s4  }
  0x14   :  { %s37_s7 = sshll.u32 %s1798_s24, 4  ;;  %s2273_s0 = sld [smem:[#allocation24_spill]]  ;;  %s38_s7 = int_to_ptr.vmem [resolvable:$true] %s37_s7 }
  0x15   :  { %s91_s5 = sshll.u32 %s2249_s6, 4  ;;  %s1799_s22 = smov [#allocation7]   ;;  %s92_s5 = int_to_ptr.hbm [resolvable:$true] %s91_s5 }
  0x16   :  { %s35_s2 = sshll.u32 %s2272_s23, 4  ;;  %s67_s23 = sshll.u32 %s1799_s22, 4  ;;  %s36_s2 = int_to_ptr.hbm [resolvable:$true] %s35_s2  ;;  %s68_s23 = int_to_ptr.vmem [resolvable:$true] %s67_s23 }
  0x17   :  { %43 = dma.hbm_to_vmem [thread:$0]  %s36_s2, 256, %s38_s7, [#allocation3], %s1794_s28, %s1794_s28, %s1795_s4  }
  0x18   :  { %s1800_s1 = smov [#allocation10]   ;;  %s117_s25 = sshll.u32 %s2251_s8, 4  ;;  %s118_s25 = int_to_ptr.hbm [resolvable:$true] %s117_s25 }
  0x19   :  { %s93_s3 = sshll.u32 %s1800_s1, 4  ;;  %s1801_s6 = smov [#allocation13]   ;;  %s94_s3 = int_to_ptr.vmem [resolvable:$true] %s93_s3 }
  0x1a   :  { %s65_s21 = sshll.u32 %s2273_s0, 4  ;;  %s119_s2 = sshll.u32 %s1801_s6, 4  ;;  %s66_s21 = int_to_ptr.hbm [resolvable:$true] %s65_s21  ;;  %s120_s2 = int_to_ptr.vmem [resolvable:$true] %s119_s2 }
  0x1b   :  { %73 = dma.hbm_to_vmem [thread:$0]  %s66_s21, 512, %s68_s23, [#allocation6], %s1794_s28, %s1794_s28, %s1795_s4  }
  0x1c   :  { %99 = dma.hbm_to_vmem [thread:$0]  %s92_s5, 512, %s94_s3, [#allocation9], %s1794_s28, %s1794_s28, %s1795_s4  }
  0x1d   :  { %125 = dma.hbm_to_vmem [thread:$0]  %s118_s25, 512, %s120_s2, [#allocation12], %s1794_s28, %s1794_s28, %s1795_s4  }
  0x1e   :  { %1783 = dma.done.wait [#allocation3], 256  }
  0x1f   :  { %1784 = vsyncadd [#allocation3], 4294967040 }
  0x20   :  { %1785 = dma.done.wait [#allocation6], 768  }
  0x21   :  { %1786 = vsyncadd [#allocation6], 4294966528 }
  0x22   :  { %1787 = dma.done.wait [#allocation9], 1024  }
  0x23   :  { %1788 = vsyncadd [#allocation9], 4294966272 }
  0x24   :  { %1789 = dma.done.wait [#allocation12], 1024  }
  0x25   :  { %1790 = vsyncadd [#allocation12], 4294966272  ;;  %v219_v0 = vld [vmem:[#allocation8 + $0x18] sm:$0xff]  ;;  %v218_v1 = vld [vmem:[#allocation8 + $0x10] sm:$0xff]  ;;  %vm186_vm0 = vcmask 261120   ;;  %s1802_s8 = smov 112  }
  0x26   :  { %1472 = vmatpush.msra.mxu3 %v219_v0  ;;  %232 = vmatpush.msra.mxu1 %v219_v0  ;;  %v185_v2 = vld [vmem:[#allocation7 + $0x18] sm:$0xff]  ;;  %v217_v3 = vld [vmem:[#allocation8 + $0x8] sm:$0xff]  ;;  %v184_v4 = vld [vmem:[#allocation7 + $0x10] sm:$0xff]  ;;  %v1489_v10 = vpack.i.bf16 %v218_v1, %v219_v0  ;;  %vm270_vm1 = vcmask 130048   ;;  %s2274_s0 = sld [smem:[#allocation22_spill]]  ;;  %v1803_v30 = vmov 0.0  }
  0x27   :  { %205 = vmatpush.msra.mxu0 %v185_v2  ;;  %1468 = vmatpush.msra.mxu2 %v185_v2  ;;  %v183_v5 = vld [vmem:[#allocation7 + $0x8] sm:$0xff]  ;;  %v216_v6 = vld [vmem:[#allocation8] sm:$0xff]  ;;  %v1499_v16 = vpack.i.bf16 %v184_v4, %v185_v2  ;;  %v1971_v17 = vld [vmem:[#allocation10 + $0x18] sm:$0xff]  ;;  %s2275_s25 = sld [smem:[#allocation23_spill]] }
  0x28   :  { %1473 = vmatpush.msra.mxu3 %v218_v1  ;;  %233 = vmatpush.msra.mxu1 %v218_v1  ;;  %v1953_v7 = vld [vmem:[#allocation2 + $0x8] sm:$0xff]  ;;  %v1955_v8 = vld [vmem:[#allocation2] sm:$0xff]  ;;  %v1494_v11 = vpack.i.bf16 %v216_v6, %v217_v3  ;;  %v1973_v18 = vld [vmem:[#allocation10 + $0x10] sm:$0xff] }
  0x29   :  { %206 = vmatpush.msra.mxu0 %v184_v4  ;;  %1469 = vmatpush.msra.mxu2 %v184_v4  ;;  %v182_v9 = vld [vmem:[#allocation7] sm:$0xff]  ;;  %v1977_v20 = vld [vmem:[#allocation10 + $0x8] sm:$0xff]  ;;  %v1509_v61 = vpack.i.bf16 %v1973_v18, %v1971_v17 }
  0x2a   :  { %1474 = vmatpush.msra.mxu3 %v217_v3  ;;  %234 = vmatpush.msra.mxu1 %v217_v3  ;;  %v1980_v21 = vld [vmem:[#allocation10] sm:$0xff]  ;;  %v1504_v23 = vpack.i.bf16 %v182_v9, %v183_v5 }
  0x2b   :  { %207 = vmatpush.msra.mxu0 %v183_v5  ;;  %1470 = vmatpush.msra.mxu2 %v183_v5  ;;  %v1514_v62 = vpack.i.bf16 %v1980_v21, %v1977_v20 }
  0x2c   :  { %1475 = vmatpush.msra.mxu3 %v216_v6  ;;  %235 = vmatpush.msra.mxu1 %v216_v6  ;;  %v176_v28 = vld [vmem:[%s2274_s0] sm:$0xff]  ;;  %v177_v33 = vld [vmem:[%s2274_s0 + $0x8] sm:$0xff] }
  0x2d   :  { %1407 = vmatmul.msk.f32.vlgmr.msra.gmra.mxu3 %vm186_vm0, %v1953_v7  ;;  %1406 = vmatmul.msk.f32.vlgmr.msra.gmra.mxu1 %vm186_vm0, %v1955_v8  ;;  %vm178_vm2 = vcmp.eq.f32.partialorder %v176_v28, 0.0  ;;  %vm179_vm3 = vcmp.eq.f32.partialorder %v177_v33, 0.0 }
  0x2e   :  { %208 = vmatpush.msra.mxu0 %v182_v9  ;;  %1471 = vmatpush.msra.mxu2 %v182_v9  ;;  %v1993_v31 = vsel %vm178_vm2, -1e+09, %v1803_v30  ;;  %v2003_v37 = vsel %vm179_vm3, -1e+09, %v1803_v30 }
  0x2f   :  { %1404 = vmatmul.msk.f32.vlgmr.msra.gmra.mxu0 %vm186_vm0, %v1955_v8  ;;  %1405 = vmatmul.msk.f32.vlgmr.msra.gmra.mxu2 %vm186_vm0, %v1953_v7 }
  0x30   :  { %1490 = vrot.lane.b32.xlu0 %v1489_v10, %s1802_s8  ;;  %259 = vmatpush.msrb.mxu2 %v1971_v17 }
  0x31   :  { %1500 = vrot.lane.b32.xlu1 %v1499_v16, %s1802_s8 }
  0x32   :  { %260 = vmatpush.msrb.mxu2 %v1973_v18 }
  0x34   :  { %261 = vmatpush.msrb.mxu2 %v1977_v20 }
  0x36   :  { %262 = vmatpush.msrb.mxu2 %v1980_v21 }
  0x37   :  { %1408 = vmatmul.msk.f32.vlgmr.msrb.gmra.mxu2 %vm186_vm0, %v1955_v8 }
  0x38   :  { %1495 = vrot.lane.b32.xlu0 %v1494_v11, %s1802_s8 }
  0x39   :  { %1505 = vrot.lane.b32.xlu1 %v1504_v23, %s1802_s8 }
  0x3f   :  { %1409 = vmatmul.msk.f32.gmra.mxu2 %vm186_vm0, %v1953_v7 }
  0xa2   :  { %v1491_v19 = vpop.permute.xlu0 %1490 }
  0xa3   :  { %v1492_v22 = vunpack.i.l.bf16 %v1491_v19  ;;  %v1493_v24 = vunpack.i.h.bf16 %v1491_v19  ;;  %v1501_v41 = vpop.permute.xlu1 %1500 }
  0xa4   :  { %v1502_v42 = vunpack.i.l.bf16 %v1501_v41  ;;  %v1503_v43 = vunpack.i.h.bf16 %v1501_v41 }
  0xa5   :  { %466 = vmatpush.msra.mxu2 %v1492_v22 }
  0xa6   :  { %423 = vmatpush.msrb.mxu1 %v1502_v42 }
  0xa7   :  { %467 = vmatpush.msra.mxu2 %v1493_v24 }
  0xa8   :  { %424 = vmatpush.msrb.mxu1 %v1503_v43 }
  0xaa   :  { %v237_v13 = vpop.f32.mrf.mxu1  ;;  %v1496_v25 = vpop.permute.xlu0 %1495 }
  0xab   :  { %v1497_v26 = vunpack.i.l.bf16 %v1496_v25  ;;  %v1498_v27 = vunpack.i.h.bf16 %v1496_v25  ;;  %v1506_v44 = vpop.permute.xlu1 %1505 }
  0xac   :  { %v210_v14 = vpop.f32.mrf.mxu0  ;;  %v1507_v45 = vunpack.i.l.bf16 %v1506_v44  ;;  %v1508_v46 = vunpack.i.h.bf16 %v1506_v44 }
  0xad   :  { %468 = vmatpush.msra.mxu2 %v1497_v26 }
  0xae   :  { %425 = vmatpush.msrb.mxu1 %v1507_v45 }
  0xaf   :  { %469 = vmatpush.msra.mxu2 %v1498_v27 }
  0xb0   :  { %v240_v12 = vpop.f32.mrf.mxu3  ;;  %1418 = vmatmul.msk.f32.vlgmr.msra.gmra.mxu2 %vm186_vm0, %v1955_v8  ;;  %426 = vmatpush.msrb.mxu1 %v1508_v46 }
  0xb1   :  { %1410 = vmatpush.xpose.msk.msrb.mxu3 %vm270_vm1, %v240_v12  ;;  %1416 = vmatmul.msk.f32.vlgmr.msrb.gmra.mxu1 %vm186_vm0, %v1955_v8 }
  0xb2   :  { %v213_v15 = vpop.f32.mrf.mxu2 }
  0xb5   :  { %1411 = vmatpush.xpose.msk.msrb.mxu3 %vm270_vm1, %v237_v13 }
  0xb8   :  { %1412 = vmatmul.msk.f32.vlgmr.msrb.gmra.mxu3 %vm270_vm1, %v210_v14  ;;  %1419 = vmatmul.msk.f32.gmra.mxu2 %vm186_vm0, %v1953_v7 }
  0xb9   :  { %1417 = vmatmul.msk.f32.gmra.mxu1 %vm186_vm0, %v1953_v7 }
  0xba   :  { %v264_v48 = vpop.f32.mrf.mxu2 }
  0xc0   :  { %1413 = vmatmul.msk.f32.gmra.mxu3 %vm270_vm1, %v213_v15 }
  0xc2   :  { %v267_v52 = vpop.f32.mrf.mxu2 }
  0xc3   :  { %380 = vmatpush.msrb.mxu0 %v267_v52 }
  0xc5   :  { %381 = vmatpush.msrb.mxu0 %v264_v48 }
 0x12e   :  { %v428_v25 = vpop.f32.mrf.mxu1 }
 0x133   :  { %v471_v59 = vpop.f32.mrf.mxu2 }
 0x136   :  { %v431_v26 = vpop.f32.mrf.mxu1 }
 0x13b   :  { %v300_v29 = vpop.f32.mrf.mxu3  ;;  %v474_v60 = vpop.f32.mrf.mxu2 }
 0x13c   :  { %v306_v32 = vmul.f32 0.25, %v300_v29  ;;  %1422 = vmatpush.xpose.msk.msra.mxu0 %vm270_vm1, %v474_v60 }
 0x13e   :  { %v308_v34 = vadd.f32 %v306_v32, %v1993_v31 }
 0x140   :  { %v310_v35 = vsel %vm270_vm1, %v308_v34, -inf  ;;  %1423 = vmatpush.xpose.msk.msra.mxu0 %vm270_vm1, %v471_v59 }
 0x141   :  { %311 = vmax.xlane.f32.xlu2 %v310_v35  ;;  %v390_v35 = vld [vmem:[#allocation11 + $0x8] sm:$0xff] }
 0x143   :  { %v303_v36 = vpop.f32.mrf.mxu3 }
 0x144   :  { %v307_v38 = vmul.f32 0.25, %v303_v36  ;;  %v389_v36 = vld [vmem:[#allocation11] sm:$0xff] }
 0x146   :  { %v309_v39 = vadd.f32 %v307_v38, %v2003_v37 }
 0x148   :  { %v313_v40 = vsel %vm270_vm1, %v309_v39, -inf }
 0x149   :  { %314 = vmax.xlane.f32.xlu2 %v313_v40 }
 0x161   :  { %1510 = vrot.lane.b32.xlu2 %v1509_v61, %s1802_s8 }
 0x169   :  { %1515 = vrot.lane.b32.xlu2 %v1514_v62, %s1802_s8 }
 0x1b4   :  { %v312_v47 = vpop.xlane.xlu2 %311 }
 0x1b5   :  { %v316_v49 = vsub.f32 %v308_v34, %v312_v47 }
 0x1b7   :  { %v318_v50 = vmul.f32 1.442695, %v316_v49 }
 0x1b9   :  { %1553 = vpow2.f32 %v318_v50 }
 0x1bc   :  { %v315_v51 = vpop.xlane.xlu2 %314 }
 0x1bd   :  { %v317_v53 = vsub.f32 %v309_v39, %v315_v51 }
 0x1bf   :  { %v1554_v54 = vpop.eup %1553  ;;  %v320_v55 = vmul.f32 1.442695, %v317_v53 }
 0x1c0   :  { %v322_v56 = vsel %vm270_vm1, %v1554_v54, 0.0 }
 0x1c1   :  { %1555 = vpow2.f32 %v320_v55  ;;  %323 = vadd.xlane.f32.xlu0 %v322_v56  ;;  %v640_v56 = vld [vmem:[#allocation11 + $0x18] sm:$0xff] }
 0x1c2   :  { %661 = vmatpush.msrb.mxu2 %v640_v56  ;;  %v771_v56 = vld [vmem:[%s2253_s10] sm:$0xff] }
 0x1c4   :  { %v1511_v27 = vpop.permute.xlu2 %1510 }
 0x1c5   :  { %v1513_v28 = vunpack.i.h.bf16 %v1511_v27  ;;  %v1512_v29 = vunpack.i.l.bf16 %v1511_v27  ;;  %v921_v27 = vld [vmem:[#allocation13 + $0x18] sm:$0xff] }
 0x1c7   :  { %v1556_v57 = vpop.eup %1555  ;;  %509 = vmatpush.msra.mxu3 %v1512_v29  ;;  %v738_v29 = vld [vmem:[%s2252_s9] sm:$0xff] }
 0x1c8   :  { %v325_v58 = vsel %vm270_vm1, %v1556_v57, 0.0 }
 0x1c9   :  { %326 = vadd.xlane.f32.xlu1 %v325_v58  ;;  %510 = vmatpush.msra.mxu3 %v1513_v28  ;;  %v739_v28 = vld [vmem:[%s2252_s9 + $0x8] sm:$0xff] }
 0x1cc   :  { %v1516_v32 = vpop.permute.xlu2 %1515 }
 0x1cd   :  { %v1518_v33 = vunpack.i.h.bf16 %v1516_v32  ;;  %v1517_v34 = vunpack.i.l.bf16 %v1516_v32 }
 0x1cf   :  { %511 = vmatpush.msra.mxu3 %v1517_v34  ;;  %v2076_v34 = vld [vmem:[#allocation5 + $0x8] sm:$0xff] }
 0x1d1   :  { %512 = vmatpush.msra.mxu3 %v1518_v33  ;;  %v2070_v33 = vld [vmem:[#allocation5] sm:$0xff] }
 0x1d2   :  { %1420 = vmatmul.msk.f32.vlgmr.msra.gmra.mxu3 %vm186_vm0, %v1955_v8 }
 0x1d3   :  { %690 = vmatpush.msrb.mxu3 %v390_v35 }
 0x1d5   :  { %691 = vmatpush.msrb.mxu3 %v389_v36 }
 0x1da   :  { %1421 = vmatmul.msk.f32.gmra.mxu3 %vm186_vm0, %v1953_v7 }
 0x234   :  { %v324_v63 = vpop.xlane.xlu0 %323 }
 0x235   :  { %1557 = vrcp.f32 %v324_v63  ;;  %v339_v4 = vand.u32 2147483648, %v324_v63  ;;  %v337_v6 = vand.u32 2147483647, %v324_v63  ;;  %vm333_vm5 = vweird.f32 %v324_v63 }
 0x237   :  { %v340_v11 = vor.u32 1.1754944e-38, %v339_v4  ;;  %vm338_vm7 = vcmp.eq.f32.partialorder %v337_v6, 8.507059e+37 }
 0x23b   :  { %v1558_v0 = vpop.eup %1557 }
 0x23c   :  { %v329_v1 = vmul.f32 %v1558_v0, %v324_v63  ;;  %v327_v2 = vpop.xlane.xlu1 %326  ;;  %vm334_vm4 = vweird.f32 %v1558_v0 }
 0x23d   :  { %1559 = vrcp.f32 %v327_v2  ;;  %vm335_vm6 = vmor %vm333_vm5, %vm334_vm4  ;;  %v353_v17 = vand.u32 2147483648, %v327_v2  ;;  %v351_v19 = vand.u32 2147483647, %v327_v2  ;;  %vm347_vm9 = vweird.f32 %v327_v2 }
 0x23e   :  { %v330_v3 = vsub.f32 1.0, %v329_v1 }
 0x23f   :  { %v354_v21 = vor.u32 1.1754944e-38, %v353_v17  ;;  %vm352_vm11 = vcmp.eq.f32.partialorder %v351_v19, 8.507059e+37 }
 0x240   :  { %v331_v5 = vmul.f32 %v1558_v0, %v330_v3 }
 0x242   :  { %v332_v9 = vadd.f32 %v1558_v0, %v331_v5 }
 0x243   :  { %v1560_v10 = vpop.eup %1559 }
 0x244   :  { %v343_v12 = vmul.f32 %v1560_v10, %v327_v2  ;;  %v336_v13 = vsel %vm335_vm6, %v1558_v0, %v332_v9  ;;  %vm348_vm8 = vweird.f32 %v1560_v10 }
 0x245   :  { %v341_v14 = vsel %vm338_vm7, %v340_v11, %v336_v13  ;;  %vm349_vm10 = vmor %vm347_vm9, %vm348_vm8 }
 0x246   :  { %v344_v15 = vsub.f32 1.0, %v343_v12  ;;  %v356_v16 = vmul.f32 %v1554_v54, %v341_v14 }
 0x248   :  { %v345_v18 = vmul.f32 %v1560_v10, %v344_v15  ;;  %358 = vst.msk [vmem:[%s2262_s19] sm:$0xff] %vm270_vm1, %v356_v16  ;;  %1414 = vmatmul.msk.f32.vlgmr.msrb.gmra.mxu0 %vm270_vm1, %v356_v16 }
 0x249   :  { %727 = vmatpush.msrb.mxu0 %v921_v27 }
 0x24a   :  { %v346_v20 = vadd.f32 %v1560_v10, %v345_v18 }
 0x24c   :  { %v350_v22 = vsel %vm349_vm10, %v1560_v10, %v346_v20  ;;  %v963_v20 = vld [vmem:[%s2252_s9 + $0x10] sm:$0xff] }
 0x24d   :  { %v355_v23 = vsel %vm352_vm11, %v354_v21, %v350_v22  ;;  %v964_v21 = vld [vmem:[%s2252_s9 + $0x18] sm:$0xff] }
 0x24e   :  { %v357_v24 = vmul.f32 %v1556_v57, %v355_v23  ;;  %v639_v57 = vld [vmem:[#allocation11 + $0x10] sm:$0xff]  ;;  %v1519_v22 = vpack.i.bf16 %v963_v20, %v964_v21  ;;  %v918_v23 = vld [vmem:[#allocation13] sm:$0xff] }
 0x24f   :  { %662 = vmatpush.msrb.mxu2 %v639_v57 }
 0x250   :  { %359 = vst.msk [vmem:[%s2262_s19 + $0x8] sm:$0xff] %vm270_vm1, %v357_v24  ;;  %1415 = vmatmul.msk.f32.gmra.mxu0 %vm270_vm1, %v357_v24  ;;  %v919_v24 = vld [vmem:[#allocation13 + $0x8] sm:$0xff] }
 0x255   :  { %v514_v46 = vpop.f32.mrf.mxu3 }
 0x258   :  { %1424 = vmatmul.msk.f32.vlgmr.msra.gmra.mxu0 %vm270_vm1, %v428_v25  ;;  %v920_v25 = vld [vmem:[#allocation13 + $0x10] sm:$0xff] }
 0x259   :  { %v1529_v32 = vpack.i.bf16 %v920_v25, %v921_v27  ;;  %728 = vmatpush.msrb.mxu0 %v920_v25 }
 0x25b   :  { %729 = vmatpush.msrb.mxu0 %v919_v24 }
 0x25d   :  { %v517_v47 = vpop.f32.mrf.mxu3  ;;  %730 = vmatpush.msrb.mxu0 %v918_v23 }
 0x25e   :  { %630 = vmatpush.msra.mxu1 %v517_v47 }
 0x260   :  { %1425 = vmatmul.msk.f32.gmra.mxu0 %vm270_vm1, %v431_v26  ;;  %631 = vmatpush.msra.mxu1 %v514_v46  ;;  %v1534_v26 = vpack.i.bf16 %v918_v23, %v919_v24 }
 0x262   :  { %760 = vmatpush.msrb.mxu1 %v964_v21 }
 0x264   :  { %761 = vmatpush.msrb.mxu1 %v963_v20 }
 0x266   :  { %762 = vmatpush.msrb.mxu1 %v739_v28 }
 0x268   :  { %763 = vmatpush.msrb.mxu1 %v738_v29 }
 0x2c5   :  { %v383_v38 = vpop.f32.mrf.mxu0 }
 0x2c6   :  { %1432 = vmatmul.msk.f32.vlgmr.msrb.gmra.mxu3 %vm270_vm1, %v383_v38 }
 0x2cd   :  { %v386_v39 = vpop.f32.mrf.mxu0 }
 0x2ce   :  { %1433 = vmatmul.msk.f32.gmra.mxu3 %vm270_vm1, %v386_v39 }
 0x2d5   :  { %v549_v40 = vpop.f32.mrf.mxu0 }
 0x2d6   :  { %v555_v41 = vmul.f32 0.25, %v549_v40 }
 0x2d8   :  { %v557_v42 = vadd.f32 %v555_v41, %v1993_v31 }
 0x2da   :  { %v559_v43 = vsel %vm270_vm1, %v557_v42, -inf }
 0x2db   :  { %560 = vmax.xlane.f32.xlu2 %v559_v43 }
 0x2dd   :  { %v552_v8 = vpop.f32.mrf.mxu0 }
 0x2de   :  { %v556_v44 = vmul.f32 0.25, %v552_v8 }
 0x2e0   :  { %v558_v45 = vadd.f32 %v556_v44, %v2003_v37 }
 0x2e2   :  { %v562_v7 = vsel %vm270_vm1, %v558_v45, -inf }
 0x2e3   :  { %563 = vmax.xlane.f32.xlu0 %v562_v7 }
 0x2f3   :  { %1530 = vrot.lane.b32.xlu2 %v1529_v32, %s1802_s8 }
 0x349   :  { %v693_v7 = vpop.f32.mrf.mxu3 }
 0x34e   :  { %v561_v48 = vpop.xlane.xlu2 %560 }
 0x34f   :  { %v565_v49 = vsub.f32 %v557_v42, %v561_v48 }
 0x351   :  { %v567_v50 = vmul.f32 1.442695, %v565_v49  ;;  %v696_v48 = vpop.f32.mrf.mxu3 }
 0x353   :  { %1561 = vpow2.f32 %v567_v50 }
 0x356   :  { %v564_v51 = vpop.xlane.xlu0 %563  ;;  %v1531_v38 = vpop.permute.xlu2 %1530 }
 0x357   :  { %v566_v31 = vsub.f32 %v558_v45, %v564_v51  ;;  %v1533_v39 = vunpack.i.h.bf16 %v1531_v38  ;;  %v1532_v40 = vunpack.i.l.bf16 %v1531_v38  ;;  %v1524_v51 = vpack.i.bf16 %v738_v29, %v739_v28 }
 0x359   :  { %v1562_v52 = vpop.eup %1561  ;;  %v569_v53 = vmul.f32 1.442695, %v566_v31 }
 0x35a   :  { %v571_v54 = vsel %vm270_vm1, %v1562_v52, 0.0 }
 0x35b   :  { %1563 = vpow2.f32 %v569_v53  ;;  %572 = vadd.xlane.f32.xlu1 %v571_v54  ;;  %v774_v53 = vld [vmem:[%s2253_s10 + $0x18] sm:$0xff]  ;;  %v773_v54 = vld [vmem:[%s2253_s10 + $0x10] sm:$0xff] }
 0x35c   :  { %787 = vmatpush.msra.mxu2 %v774_v53 }
 0x35e   :  { %788 = vmatpush.msra.mxu2 %v773_v54 }
 0x361   :  { %v1564_v37 = vpop.eup %1563 }
 0x362   :  { %v574_v55 = vsel %vm270_vm1, %v1564_v37, 0.0 }
 0x363   :  { %575 = vadd.xlane.f32.xlu0 %v574_v55 }
 0x374   :  { %1520 = vrot.lane.b32.xlu1 %v1519_v22, %s1802_s8  ;;  %v1539_v22 = vpack.i.bf16 %v773_v54, %v774_v53 }
 0x377   :  { %1525 = vrot.lane.b32.xlu0 %v1524_v51, %s1802_s8 }
 0x37c   :  { %1535 = vrot.lane.b32.xlu1 %v1534_v26, %s1802_s8 }
 0x3ce   :  { %v573_v58 = vpop.xlane.xlu1 %572 }
 0x3cf   :  { %1565 = vrcp.f32 %v573_v58  ;;  %v588_v63 = vand.u32 2147483648, %v573_v58  ;;  %v586_v1 = vand.u32 2147483647, %v573_v58  ;;  %vm582_vm13 = vweird.f32 %v573_v58 }
 0x3d1   :  { %v589_v4 = vor.u32 1.1754944e-38, %v588_v63  ;;  %vm587_vm15 = vcmp.eq.f32.partialorder %v586_v1, 8.507059e+37  ;;  %v700_v1 = vld [vmem:[%s2275_s25 + $0x8] sm:$0xff] }
 0x3d2   :  { %vm702_vm7 = vcmp.eq.f32.partialorder %v700_v1, 0.0 }
 0x3d5   :  { %v1566_v59 = vpop.eup %1565 }
 0x3d6   :  { %v578_v60 = vmul.f32 %v1566_v59, %v573_v58  ;;  %v576_v61 = vpop.xlane.xlu0 %575  ;;  %vm583_vm12 = vweird.f32 %v1566_v59 }
 0x3d7   :  { %1567 = vrcp.f32 %v576_v61  ;;  %vm584_vm14 = vmor %vm582_vm13, %vm583_vm12  ;;  %v602_v12 = vand.u32 2147483648, %v576_v61  ;;  %v600_v14 = vand.u32 2147483647, %v576_v61  ;;  %vm596_vm3 = vweird.f32 %v576_v61 }
 0x3d8   :  { %v579_v62 = vsub.f32 1.0, %v578_v60 }
 0x3d9   :  { %v603_v16 = vor.u32 1.1754944e-38, %v602_v12  ;;  %vm601_vm5 = vcmp.eq.f32.partialorder %v600_v14, 8.507059e+37 }
 0x3da   :  { %v580_v0 = vmul.f32 %v1566_v59, %v579_v62 }
 0x3dc   :  { %v581_v2 = vadd.f32 %v1566_v59, %v580_v0 }
 0x3dd   :  { %v1568_v3 = vpop.eup %1567 }
 0x3de   :  { %v585_v5 = vsel %vm584_vm14, %v1566_v59, %v581_v2  ;;  %v592_v6 = vmul.f32 %v1568_v3, %v576_v61  ;;  %vm597_vm2 = vweird.f32 %v1568_v3  ;;  %v699_v61 = vld [vmem:[%s2275_s25] sm:$0xff] }
 0x3df   :  { %v590_v9 = vsel %vm587_vm15, %v589_v4, %v585_v5  ;;  %vm598_vm4 = vmor %vm596_vm3, %vm597_vm2  ;;  %vm701_vm6 = vcmp.eq.f32.partialorder %v699_v61, 0.0  ;;  %v2121_v5 = vsel %vm702_vm7, -1e+09, %v1803_v30 }
 0x3e0   :  { %v593_v10 = vsub.f32 1.0, %v592_v6  ;;  %v605_v11 = vmul.f32 %v1562_v52, %v590_v9  ;;  %v2111_v63 = vsel %vm701_vm6, -1e+09, %v1803_v30 }
 0x3e2   :  { %v594_v13 = vmul.f32 %v1568_v3, %v593_v10  ;;  %1426 = vst.msk [vmem:[%s2262_s19 + $0x10] sm:$0xff] %vm270_vm1, %v605_v11  ;;  %1428 = vmatmul.msk.f32.vlgmr.msra.gmra.mxu1 %vm270_vm1, %v605_v11 }
 0x3e3   :  { %950 = vmatpush.msra.mxu1 %v1532_v40 }
 0x3e4   :  { %v595_v15 = vadd.f32 %v1568_v3, %v594_v13 }
 0x3e5   :  { %951 = vmatpush.msra.mxu1 %v1533_v39 }
 0x3e6   :  { %v599_v17 = vsel %vm598_vm4, %v1568_v3, %v595_v15  ;;  %v1521_v41 = vpop.permute.xlu1 %1520 }
 0x3e7   :  { %v604_v18 = vsel %vm601_vm5, %v603_v16, %v599_v17  ;;  %v1522_v55 = vunpack.i.l.bf16 %v1521_v41  ;;  %v1523_v58 = vunpack.i.h.bf16 %v1521_v41 }
 0x3e8   :  { %v606_v19 = vmul.f32 %v1564_v37, %v604_v18  ;;  %v772_v37 = vld [vmem:[%s2253_s10 + $0x8] sm:$0xff] }
 0x3e9   :  { %789 = vmatpush.msra.mxu2 %v772_v37  ;;  %v1526_v57 = vpop.permute.xlu0 %1525  ;;  %v1544_v24 = vpack.i.bf16 %v771_v56, %v772_v37 }
 0x3ea   :  { %1427 = vst.msk [vmem:[%s2262_s19 + $0x18] sm:$0xff] %vm270_vm1, %v606_v19  ;;  %1429 = vmatmul.msk.f32.gmra.mxu1 %vm270_vm1, %v606_v19  ;;  %v1527_v59 = vunpack.i.l.bf16 %v1526_v57  ;;  %v1528_v60 = vunpack.i.h.bf16 %v1526_v57  ;;  %s1380_s19 = sshll.u32 %s2261_s18, 4  ;;  %s1381_s19 = int_to_ptr.hbm [resolvable:$true] %s1380_s19 }
 0x3eb   :  { %790 = vmatpush.msra.mxu2 %v771_v56 }
 0x3ee   :  { %v1536_v42 = vpop.permute.xlu1 %1535 }
 0x3ef   :  { %v1538_v43 = vunpack.i.h.bf16 %v1536_v42  ;;  %v1537_v8 = vunpack.i.l.bf16 %v1536_v42 }
 0x3f1   :  { %952 = vmatpush.msra.mxu1 %v1537_v8 }
 0x3f2   :  { %1436 = vmatmul.msk.f32.vlgmr.msrb.gmra.mxu1 %vm186_vm0, %v2070_v33 }
 0x3f3   :  { %953 = vmatpush.msra.mxu1 %v1538_v43 }
 0x3fa   :  { %1437 = vmatmul.msk.f32.gmra.mxu1 %vm186_vm0, %v2076_v34 }
 0x45f   :  { %v633_v35 = vpop.f32.mrf.mxu1 }
 0x460   :  { %1430 = vmatmul.msk.f32.vlgmr.msrb.gmra.mxu2 %vm270_vm1, %v633_v35 }
 0x461   :  { %993 = vmatpush.msrb.mxu2 %v1522_v55 }
 0x463   :  { %994 = vmatpush.msrb.mxu2 %v1523_v58 }
 0x465   :  { %995 = vmatpush.msrb.mxu2 %v1527_v59  ;;  %v917_v59 = vld [vmem:[%s2254_s11 + $0x8] sm:$0xff] }
 0x467   :  { %v636_v36 = vpop.f32.mrf.mxu1  ;;  %996 = vmatpush.msrb.mxu2 %v1528_v60  ;;  %v916_v60 = vld [vmem:[%s2254_s11] sm:$0xff] }
 0x468   :  { %1431 = vmatmul.msk.f32.gmra.mxu2 %vm270_vm1, %v636_v36 }
 0x46f   :  { %v765_v44 = vpop.f32.mrf.mxu1 }
 0x470   :  { %1438 = vmatmul.msk.f32.vlgmr.msra.gmra.mxu2 %vm186_vm0, %v2070_v33 }
 0x477   :  { %v768_v45 = vpop.f32.mrf.mxu1 }
 0x478   :  { %1440 = vmatpush.xpose.msk.msra.mxu3 %vm270_vm1, %v768_v45  ;;  %1439 = vmatmul.msk.f32.gmra.mxu2 %vm186_vm0, %v2076_v34 }
 0x47c   :  { %1441 = vmatpush.xpose.msk.msra.mxu3 %vm270_vm1, %v765_v44 }
 0x480   :  { %1448 = vmatmul.msk.f32.vlgmr.msrb.gmra.mxu2 %vm186_vm0, %v2070_v33 }
 0x488   :  { %1449 = vmatmul.msk.f32.gmra.mxu2 %vm186_vm0, %v2076_v34 }
 0x4e3   :  { %v664_v46 = vpop.f32.mrf.mxu2 }
 0x4e4   :  { %v694_v47 = vadd.f32 %v693_v7, %v664_v46 }
 0x4e6   :  { %1434 = vmatmul.msk.f32.vlgmr.msrb.gmra.mxu0 %vm186_vm0, %v694_v47  ;;  %1446 = vmatmul.msk.f32.vlgmr.msra.gmra.mxu1 %vm186_vm0, %v694_v47 }
 0x4eb   :  { %v667_v49 = vpop.f32.mrf.mxu2 }
 0x4ec   :  { %v697_v50 = vadd.f32 %v696_v48, %v667_v49 }
 0x4ee   :  { %1435 = vmatmul.msk.f32.gmra.mxu0 %vm186_vm0, %v697_v50  ;;  %1447 = vmatmul.msk.f32.gmra.mxu1 %vm186_vm0, %v697_v50 }
 0x4f3   :  { %v792_v13 = vpop.f32.mrf.mxu2 }
 0x4fb   :  { %v795_v17 = vpop.f32.mrf.mxu2 }
 0x4fc   :  { %907 = vmatpush.msra.mxu0 %v795_v17 }
 0x4fe   :  { %908 = vmatpush.msra.mxu0 %v792_v13 }
 0x503   :  { %v998_v23 = vpop.f32.mrf.mxu2 }
 0x50b   :  { %v1001_v25 = vpop.f32.mrf.mxu2 }
 0x50c   :  { %1452 = vmatpush.xpose.msk.msrb.mxu0 %vm270_vm1, %v1001_v25 }
 0x510   :  { %1453 = vmatpush.xpose.msk.msrb.mxu0 %vm270_vm1, %v998_v23 }
 0x563   :  { %v732_v31 = vpop.f32.mrf.mxu0 }
 0x564   :  { %1442 = vmatmul.msk.f32.vlgmr.msra.gmra.mxu3 %vm270_vm1, %v732_v31 }
 0x56b   :  { %v735_v52 = vpop.f32.mrf.mxu0 }
 0x56c   :  { %1443 = vmatmul.msk.f32.gmra.mxu3 %vm270_vm1, %v735_v52  ;;  %v955_v52 = vpop.f32.mrf.mxu1 }
 0x574   :  { %v958_v53 = vpop.f32.mrf.mxu1 }
 0x5e7   :  { %v827_v62 = vpop.f32.mrf.mxu3 }
 0x5e8   :  { %v833_v0 = vmul.f32 0.25, %v827_v62 }
 0x5ea   :  { %v835_v2 = vadd.f32 %v833_v0, %v2111_v63 }
 0x5ec   :  { %v837_v3 = vsel %vm270_vm1, %v835_v2, -inf }
 0x5ed   :  { %838 = vmax.xlane.f32.xlu0 %v837_v3 }
 0x5ef   :  { %v830_v4 = vpop.f32.mrf.mxu3 }
 0x5f0   :  { %v834_v6 = vmul.f32 0.25, %v830_v4 }
 0x5f2   :  { %v836_v9 = vadd.f32 %v834_v6, %v2121_v5 }
 0x5f4   :  { %v840_v10 = vsel %vm270_vm1, %v836_v9, -inf }
 0x5f5   :  { %841 = vmax.xlane.f32.xlu1 %v840_v10 }
 0x60e   :  { %1540 = vrot.lane.b32.xlu1 %v1539_v22, %s1802_s8 }
 0x660   :  { %v839_v11 = vpop.xlane.xlu0 %838 }
 0x661   :  { %v843_v12 = vsub.f32 %v835_v2, %v839_v11 }
 0x663   :  { %v845_v14 = vmul.f32 1.442695, %v843_v12 }
 0x665   :  { %1569 = vpow2.f32 %v845_v14 }
 0x668   :  { %v842_v15 = vpop.xlane.xlu1 %841 }
 0x669   :  { %v844_v16 = vsub.f32 %v836_v9, %v842_v15 }
 0x66b   :  { %v1570_v30 = vpop.eup %1569  ;;  %v847_v18 = vmul.f32 1.442695, %v844_v16 }
 0x66c   :  { %v849_v19 = vsel %vm270_vm1, %v1570_v30, 0.0 }
 0x66d   :  { %1571 = vpow2.f32 %v847_v18  ;;  %850 = vadd.xlane.f32.xlu2 %v849_v19  ;;  %v1167_v18 = vld [vmem:[%s2254_s11 + $0x18] sm:$0xff]  ;;  %v1166_v19 = vld [vmem:[%s2254_s11 + $0x10] sm:$0xff] }
 0x66e   :  { %1188 = vmatpush.msra.mxu2 %v1167_v18 }
 0x670   :  { %1189 = vmatpush.msra.mxu2 %v1166_v19 }
 0x673   :  { %v1572_v20 = vpop.eup %1571 }
 0x674   :  { %v852_v21 = vsel %vm270_vm1, %v1572_v20, 0.0 }
 0x675   :  { %853 = vadd.xlane.f32.xlu0 %v852_v21 }
 0x680   :  { %v1541_v54 = vpop.permute.xlu1 %1540 }
 0x681   :  { %v1543_v37 = vunpack.i.h.bf16 %v1541_v54  ;;  %v1542_v55 = vunpack.i.l.bf16 %v1541_v54  ;;  %v1270_v54 = vld [vmem:[%s2257_s14 + $0x28] sm:$0xff] }
 0x683   :  { %1036 = vmatpush.msrb.mxu3 %v1542_v55  ;;  %v1268_v55 = vld [vmem:[%s2257_s14 + $0x18] sm:$0xff] }
 0x685   :  { %1037 = vmatpush.msrb.mxu3 %v1543_v37  ;;  %v1269_v37 = vld [vmem:[%s2257_s14 + $0x20] sm:$0xff] }
 0x689   :  { %1545 = vrot.lane.b32.xlu0 %v1544_v24, %s1802_s8 }
 0x6e0   :  { %v851_v26 = vpop.xlane.xlu2 %850 }
 0x6e1   :  { %1573 = vrcp.f32 %v851_v26  ;;  %v866_v35 = vand.u32 2147483648, %v851_v26  ;;  %v864_v38 = vand.u32 2147483647, %v851_v26  ;;  %vm860_vm9 = vweird.f32 %v851_v26 }
 0x6e3   :  { %v867_v41 = vor.u32 1.1754944e-38, %v866_v35  ;;  %vm865_vm11 = vcmp.eq.f32.partialorder %v864_v38, 8.507059e+37 }
 0x6e7   :  { %v1574_v27 = vpop.eup %1573 }
 0x6e8   :  { %v856_v28 = vmul.f32 %v1574_v27, %v851_v26  ;;  %v854_v29 = vpop.xlane.xlu0 %853  ;;  %vm861_vm8 = vweird.f32 %v1574_v27 }
 0x6e9   :  { %1575 = vrcp.f32 %v854_v29  ;;  %vm862_vm10 = vmor %vm860_vm9, %vm861_vm8  ;;  %v880_v7 = vand.u32 2147483648, %v854_v29  ;;  %v878_v47 = vand.u32 2147483647, %v854_v29  ;;  %vm874_vm13 = vweird.f32 %v854_v29 }
 0x6ea   :  { %v857_v32 = vsub.f32 1.0, %v856_v28 }
 0x6eb   :  { %v881_v49 = vor.u32 1.1754944e-38, %v880_v7  ;;  %vm879_vm15 = vcmp.eq.f32.partialorder %v878_v47, 8.507059e+37  ;;  %v1229_v47 = vld [vmem:[%s2255_s12 + $0x18] sm:$0xff] }
 0x6ec   :  { %v858_v36 = vmul.f32 %v1574_v27, %v857_v32 }
 0x6ee   :  { %v859_v39 = vadd.f32 %v1574_v27, %v858_v36 }
 0x6ef   :  { %v1576_v40 = vpop.eup %1575 }
 0x6f0   :  { %v863_v42 = vsel %vm862_vm10, %v1574_v27, %v859_v39  ;;  %v870_v43 = vmul.f32 %v1576_v40, %v854_v29  ;;  %vm875_vm12 = vweird.f32 %v1576_v40 }
 0x6f1   :  { %v868_v8 = vsel %vm865_vm11, %v867_v41, %v863_v42  ;;  %vm876_vm14 = vmor %vm874_vm13, %vm875_vm12 }
 0x6f2   :  { %v871_v44 = vsub.f32 1.0, %v870_v43  ;;  %v883_v45 = vmul.f32 %v1570_v30, %v868_v8 }
 0x6f4   :  { %v872_v46 = vmul.f32 %v1576_v40, %v871_v44  ;;  %885 = vst.msk [vmem:[%s2263_s20] sm:$0xff] %vm270_vm1, %v883_v45  ;;  %1444 = vmatmul.msk.f32.vlgmr.msra.gmra.mxu0 %vm270_vm1, %v883_v45 }
 0x6f5   :  { %1252 = vmatpush.msra.mxu0 %v1229_v47 }
 0x6f6   :  { %v873_v48 = vadd.f32 %v1576_v40, %v872_v46 }
 0x6f8   :  { %v877_v50 = vsel %vm876_vm14, %v1576_v40, %v873_v48  ;;  %v1228_v48 = vld [vmem:[%s2255_s12 + $0x10] sm:$0xff] }
 0x6f9   :  { %v882_v51 = vsel %vm879_vm15, %v881_v49, %v877_v50  ;;  %v1227_v49 = vld [vmem:[%s2255_s12 + $0x8] sm:$0xff]  ;;  %1253 = vmatpush.msra.mxu0 %v1228_v48 }
 0x6fa   :  { %v884_v31 = vmul.f32 %v1572_v20, %v882_v51 }
 0x6fb   :  { %v1546_v56 = vpop.permute.xlu0 %1545  ;;  %1254 = vmatpush.msra.mxu0 %v1227_v49 }
 0x6fc   :  { %886 = vst.msk [vmem:[%s2263_s20 + $0x8] sm:$0xff] %vm270_vm1, %v884_v31  ;;  %1445 = vmatmul.msk.f32.gmra.mxu0 %vm270_vm1, %v884_v31  ;;  %v1548_v57 = vunpack.i.h.bf16 %v1546_v56  ;;  %v1547_v58 = vunpack.i.l.bf16 %v1546_v56  ;;  %v1226_v31 = vld [vmem:[%s2255_s12] sm:$0xff] }
 0x6fd   :  { %1255 = vmatpush.msra.mxu0 %v1226_v31 }
 0x6fe   :  { %1038 = vmatpush.msrb.mxu3 %v1547_v58 }
 0x700   :  { %1039 = vmatpush.msrb.mxu3 %v1548_v57 }
 0x701   :  { %1450 = vmatmul.msk.f32.vlgmr.msrb.gmra.mxu3 %vm186_vm0, %v2070_v33 }
 0x702   :  { %1217 = vmatpush.msra.mxu3 %v917_v59 }
 0x704   :  { %1454 = vmatmul.msk.f32.vlgmr.msrb.gmra.mxu0 %vm270_vm1, %v955_v52  ;;  %1218 = vmatpush.msra.mxu3 %v916_v60  ;;  %v1272_v52 = vld [vmem:[%s2257_s14 + $0x38] sm:$0xff] }
 0x709   :  { %1451 = vmatmul.msk.f32.gmra.mxu3 %vm186_vm0, %v2076_v34 }
 0x70c   :  { %1455 = vmatmul.msk.f32.gmra.mxu0 %vm270_vm1, %v958_v53  ;;  %v1271_v53 = vld [vmem:[%s2257_s14 + $0x30] sm:$0xff] }
 0x771   :  { %v910_v61 = vpop.f32.mrf.mxu0 }
 0x772   :  { %1462 = vmatmul.msk.f32.vlgmr.msra.gmra.mxu3 %vm270_vm1, %v910_v61 }
 0x779   :  { %v913_v62 = vpop.f32.mrf.mxu0 }
 0x77a   :  { %1463 = vmatmul.msk.f32.gmra.mxu3 %vm270_vm1, %v913_v62  ;;  %v1267_v62 = vld [vmem:[%s2257_s14 + $0x10] sm:$0xff] }
 0x781   :  { %v1076_v0 = vpop.f32.mrf.mxu0 }
 0x782   :  { %v1082_v1 = vmul.f32 0.25, %v1076_v0  ;;  %v1266_v0 = vld [vmem:[%s2257_s14 + $0x8] sm:$0xff] }
 0x784   :  { %v1084_v2 = vadd.f32 %v1082_v1, %v2111_v63  ;;  %v1041_v9 = vpop.f32.mrf.mxu3  ;;  %v1265_v1 = vld [vmem:[%s2257_s14] sm:$0xff] }
 0x786   :  { %v1086_v33 = vsel %vm270_vm1, %v1084_v2, -inf }
 0x787   :  { %1087 = vmax.xlane.f32.xlu2 %v1086_v33 }
 0x789   :  { %v1079_v3 = vpop.f32.mrf.mxu0 }
 0x78a   :  { %v1083_v34 = vmul.f32 0.25, %v1079_v3 }
 0x78c   :  { %v1085_v4 = vadd.f32 %v1083_v34, %v2121_v5  ;;  %v1044_v10 = vpop.f32.mrf.mxu3 }
 0x78d   :  { %1157 = vmatpush.msrb.mxu1 %v1044_v10  ;;  %v1550_v10 = vld [vmem:[%s2258_s15] ss:$0 sm:$0xff] }
 0x78e   :  { %v1089_v6 = vsel %vm270_vm1, %v1085_v4, -inf }
 0x78f   :  { %1090 = vmax.xlane.f32.xlu2 %v1089_v6  ;;  %1158 = vmatpush.msrb.mxu1 %v1041_v9 }
 0x791   :  { %1292 = vmatpush.msra.mxu1 %v1272_v52 }
 0x793   :  { %1293 = vmatpush.msra.mxu1 %v1271_v53  ;;  %v1552_v53 = vld [vmem:[%s2260_s17] ss:$0 sm:$0xff] }
 0x795   :  { %1294 = vmatpush.msra.mxu1 %v1270_v54 }
 0x797   :  { %1295 = vmatpush.msra.mxu1 %v1269_v37 }
 0x799   :  { %1296 = vmatpush.msra.mxu1 %v1268_v55 }
 0x79b   :  { %1297 = vmatpush.msra.mxu1 %v1267_v62 }
 0x79d   :  { %1298 = vmatpush.msra.mxu1 %v1266_v0 }
 0x79f   :  { %1299 = vmatpush.msra.mxu1 %v1265_v1 }
 0x7f5   :  { %v1220_v56 = vpop.f32.mrf.mxu3 }
 0x7fa   :  { %v1088_v11 = vpop.xlane.xlu2 %1087 }
 0x7fb   :  { %v1092_v12 = vsub.f32 %v1084_v2, %v1088_v11  ;;  %v1549_v2 = vld [vmem:[%s2256_s13] ss:$0 sm:$0xff] }
 0x7fd   :  { %v1094_v13 = vmul.f32 1.442695, %v1092_v12  ;;  %v1223_v59 = vpop.f32.mrf.mxu3 }
 0x7ff   :  { %1577 = vpow2.f32 %v1094_v13 }
 0x802   :  { %v1091_v14 = vpop.xlane.xlu2 %1090 }
 0x803   :  { %v1093_v63 = vsub.f32 %v1085_v4, %v1091_v14 }
 0x805   :  { %v1578_v15 = vpop.eup %1577  ;;  %v1096_v16 = vmul.f32 1.442695, %v1093_v63 }
 0x806   :  { %v1098_v17 = vsel %vm270_vm1, %v1578_v15, 0.0 }
 0x807   :  { %1579 = vpow2.f32 %v1096_v16  ;;  %1099 = vadd.xlane.f32.xlu0 %v1098_v17 }
 0x80d   :  { %v1580_v5 = vpop.eup %1579 }
 0x80e   :  { %v1101_v30 = vsel %vm270_vm1, %v1580_v5, 0.0 }
 0x80f   :  { %1102 = vadd.xlane.f32.xlu1 %v1101_v30 }
 0x87a   :  { %v1100_v20 = vpop.xlane.xlu0 %1099 }
 0x87b   :  { %1581 = vrcp.f32 %v1100_v20  ;;  %v1115_v25 = vand.u32 2147483648, %v1100_v20  ;;  %v1113_v27 = vand.u32 2147483647, %v1100_v20  ;;  %vm1109_vm3 = vweird.f32 %v1100_v20 }
 0x87d   :  { %v1116_v32 = vor.u32 1.1754944e-38, %v1115_v25  ;;  %vm1114_vm5 = vcmp.eq.f32.partialorder %v1113_v27, 8.507059e+37 }
 0x881   :  { %v1582_v21 = vpop.eup %1581 }
 0x882   :  { %v1105_v22 = vmul.f32 %v1582_v21, %v1100_v20  ;;  %v1103_v23 = vpop.xlane.xlu1 %1102  ;;  %vm1110_vm2 = vweird.f32 %v1582_v21 }
 0x883   :  { %1583 = vrcp.f32 %v1103_v23  ;;  %vm1111_vm4 = vmor %vm1109_vm3, %vm1110_vm2  ;;  %v1129_v41 = vand.u32 2147483648, %v1103_v23  ;;  %v1127_v43 = vand.u32 2147483647, %v1103_v23  ;;  %vm1123_vm7 = vweird.f32 %v1103_v23 }
 0x884   :  { %v1106_v24 = vsub.f32 1.0, %v1105_v22 }
 0x885   :  { %v1130_v44 = vor.u32 1.1754944e-38, %v1129_v41  ;;  %vm1128_vm9 = vcmp.eq.f32.partialorder %v1127_v43, 8.507059e+37 }
 0x886   :  { %v1107_v26 = vmul.f32 %v1582_v21, %v1106_v24 }
 0x888   :  { %v1108_v28 = vadd.f32 %v1582_v21, %v1107_v26 }
 0x889   :  { %v1584_v29 = vpop.eup %1583 }
 0x88a   :  { %v1112_v35 = vsel %vm1111_vm4, %v1582_v21, %v1108_v28  ;;  %v1119_v36 = vmul.f32 %v1584_v29, %v1103_v23  ;;  %vm1124_vm6 = vweird.f32 %v1584_v29 }
 0x88b   :  { %v1117_v38 = vsel %vm1114_vm5, %v1116_v32, %v1112_v35  ;;  %vm1125_vm8 = vmor %vm1123_vm7, %vm1124_vm6 }
 0x88c   :  { %v1132_v39 = vmul.f32 %v1578_v15, %v1117_v38  ;;  %v1120_v40 = vsub.f32 1.0, %v1119_v36 }
 0x88e   :  { %1456 = vst.msk [vmem:[%s2263_s20 + $0x10] sm:$0xff] %vm270_vm1, %v1132_v39  ;;  %v1121_v42 = vmul.f32 %v1584_v29, %v1120_v40  ;;  %1458 = vmatmul.msk.f32.vlgmr.msrb.gmra.mxu1 %vm270_vm1, %v1132_v39 }
 0x890   :  { %v1122_v8 = vadd.f32 %v1584_v29, %v1121_v42 }
 0x892   :  { %v1126_v45 = vsel %vm1125_vm8, %v1584_v29, %v1122_v8 }
 0x893   :  { %v1131_v7 = vsel %vm1128_vm9, %v1130_v44, %v1126_v45 }
 0x894   :  { %v1133_v46 = vmul.f32 %v1580_v5, %v1131_v7  ;;  %v1804_v5 = vmov 32.0  }
 0x895   :  { %1585 = vrcp.f32 %v1804_v5 }
 0x896   :  { %1457 = vst.msk [vmem:[%s2263_s20 + $0x18] sm:$0xff] %vm270_vm1, %v1133_v46  ;;  %1459 = vmatmul.msk.f32.gmra.mxu1 %vm270_vm1, %v1133_v46 }
 0x89b   :  { %v1586_v30 = vpop.eup %1585 }
 0x89c   :  { %v1316_v18 = vmul.f32 32.0, %v1586_v30  ;;  %vm1320_vm10 = vweird.f32 %v1586_v30 }
 0x89e   :  { %v1317_v19 = vsub.f32 1.0, %v1316_v18 }
 0x8a0   :  { %v1318_v20 = vmul.f32 %v1586_v30, %v1317_v19 }
 0x8a2   :  { %v1319_v21 = vadd.f32 %v1586_v30, %v1318_v20 }
 0x8a4   :  { %v1321_v22 = vsel %vm1320_vm10, %v1586_v30, %v1319_v21 }
 0x90b   :  { %v1160_v50 = vpop.f32.mrf.mxu1 }
 0x90c   :  { %1460 = vmatmul.msk.f32.vlgmr.msra.gmra.mxu2 %vm270_vm1, %v1160_v50  ;;  %v1551_v50 = vld [vmem:[%s2259_s16] ss:$0 sm:$0xff]  ;;  %s1805_s16 = smov [#allocation14]  }
 0x90d   :  { %s1378_s20 = sshll.u32 %s1805_s16, 4  ;;  %s1379_s20 = int_to_ptr.vmem [resolvable:$true] %s1378_s20 }
 0x913   :  { %v1163_v51 = vpop.f32.mrf.mxu1 }
 0x914   :  { %1461 = vmatmul.msk.f32.gmra.mxu2 %vm270_vm1, %v1163_v51  ;;  %vm1277_vm1 = vcmask 523264  }
 0x98f   :  { %v1191_v57 = vpop.f32.mrf.mxu2 }
 0x990   :  { %v1221_v58 = vadd.f32 %v1220_v56, %v1191_v57 }
 0x992   :  { %1464 = vmatmul.msk.f32.vlgmr.msra.gmra.mxu0 %vm186_vm0, %v1221_v58 }
 0x997   :  { %v1194_v60 = vpop.f32.mrf.mxu2 }
 0x998   :  { %v1224_v61 = vadd.f32 %v1223_v59, %v1194_v60 }
 0x99a   :  { %1465 = vmatmul.msk.f32.gmra.mxu0 %vm186_vm0, %v1224_v61 }
 0xa0f   :  { %v1257_v33 = vpop.f32.mrf.mxu0 }
 0xa10   :  { %v1258_v3 = vadd.f32 %v1549_v2, %v1257_v33 }
 0xa12   :  { %v1263_v34 = vmax.f32 %v1258_v3, 0.0 }
 0xa14   :  { %1466 = vmatmul.msk.f32.vlgmr.msra.gmra.mxu1 %vm1277_vm1, %v1263_v34 }
 0xa17   :  { %v1260_v4 = vpop.f32.mrf.mxu0 }
 0xa18   :  { %v1261_v6 = vadd.f32 %v1549_v2, %v1260_v4 }
 0xa1a   :  { %v1264_v9 = vmax.f32 %v1261_v6, 0.0 }
 0xa1c   :  { %1467 = vmatmul.msk.f32.gmra.mxu1 %vm1277_vm1, %v1264_v9 }
 0xa91   :  { %v1301_v11 = vpop.f32.mrf.mxu1 }
 0xa92   :  { %v1302_v12 = vadd.f32 %v1550_v10, %v1301_v11 }
 0xa94   :  { %v1307_v13 = vadd.f32 %v1302_v12, %v1221_v58 }
 0xa96   :  { %v1309_v14 = vsel %vm186_vm0, %v1307_v13, 0.0 }
 0xa97   :  { %1310 = vadd.xlane.f32.xlu2 %v1309_v14 }
 0xa99   :  { %v1304_v63 = vpop.f32.mrf.mxu1 }
 0xa9a   :  { %v1305_v15 = vadd.f32 %v1550_v10, %v1304_v63 }
 0xa9c   :  { %v1308_v16 = vadd.f32 %v1305_v15, %v1224_v61 }
 0xa9e   :  { %v1312_v17 = vsel %vm186_vm0, %v1308_v16, 0.0 }
 0xa9f   :  { %1313 = vadd.xlane.f32.xlu2 %v1312_v17 }
 0xb0a   :  { %v1311_v23 = vpop.xlane.xlu2 %1310 }
 0xb0b   :  { %v1322_v24 = vmul.f32 %v1321_v22, %v1311_v23 }
 0xb0d   :  { %v1324_v25 = vsub.f32 %v1307_v13, %v1322_v24 }
 0xb0f   :  { %v1326_v26 = vmul.f32 %v1324_v25, %v1324_v25 }
 0xb11   :  { %v1328_v27 = vsel %vm186_vm0, %v1326_v26, 0.0 }
 0xb12   :  { %1329 = vadd.xlane.f32.xlu2 %v1328_v27  ;;  %v1314_v28 = vpop.xlane.xlu2 %1313 }
 0xb13   :  { %v1323_v29 = vmul.f32 %v1321_v22, %v1314_v28 }
 0xb15   :  { %v1325_v32 = vsub.f32 %v1308_v16, %v1323_v29 }
 0xb17   :  { %v1327_v35 = vmul.f32 %v1325_v32, %v1325_v32 }
 0xb19   :  { %v1331_v36 = vsel %vm186_vm0, %v1327_v35, 0.0 }
 0xb1a   :  { %1332 = vadd.xlane.f32.xlu2 %v1331_v36 }
 0xb85   :  { %v1330_v38 = vpop.xlane.xlu2 %1329 }
 0xb86   :  { %v1334_v39 = vmul.f32 %v1330_v38, %v1321_v22 }
 0xb88   :  { %v1336_v40 = vadd.f32 1e-06, %v1334_v39 }
 0xb8a   :  { %1587 = vrsqrt.f32 %v1336_v40  ;;  %vm1344_vm12 = vweird.f32 %v1336_v40 }
 0xb8d   :  { %v1333_v41 = vpop.xlane.xlu2 %1332 }
 0xb8e   :  { %v1335_v42 = vmul.f32 %v1333_v41, %v1321_v22 }
 0xb90   :  { %v1588_v43 = vpop.eup %1587  ;;  %v1337_v8 = vadd.f32 1e-06, %v1335_v42 }
 0xb91   :  { %v1339_v44 = vmul.f32 %v1588_v43, %v1336_v40  ;;  %vm1345_vm11 = vweird.f32 %v1588_v43 }
 0xb92   :  { %1589 = vrsqrt.f32 %v1337_v8  ;;  %vm1346_vm13 = vmor %vm1344_vm12, %vm1345_vm11  ;;  %vm1354_vm15 = vweird.f32 %v1337_v8 }
 0xb93   :  { %v1340_v45 = vmul.f32 %v1588_v43, %v1339_v44 }
 0xb95   :  { %v1341_v7 = vmul.f32 0.5, %v1340_v45 }
 0xb97   :  { %v1342_v46 = vsub.f32 1.5, %v1341_v7 }
 0xb98   :  { %v1590_v47 = vpop.eup %1589 }
 0xb99   :  { %v1343_v48 = vmul.f32 %v1588_v43, %v1342_v46  ;;  %v1349_v49 = vmul.f32 %v1590_v47, %v1337_v8  ;;  %vm1355_vm14 = vweird.f32 %v1590_v47 }
 0xb9a   :  { %vm1356_vm2 = vmor %vm1354_vm15, %vm1355_vm14 }
 0xb9b   :  { %v1347_v51 = vsel %vm1346_vm13, %v1588_v43, %v1343_v48  ;;  %v1350_v31 = vmul.f32 %v1590_v47, %v1349_v49 }
 0xb9c   :  { %v1358_v52 = vmul.f32 %v1347_v51, %v1324_v25 }
 0xb9d   :  { %v1351_v54 = vmul.f32 0.5, %v1350_v31 }
 0xb9e   :  { %v1364_v37 = vmul.f32 %v1551_v50, %v1358_v52 }
 0xb9f   :  { %v1352_v55 = vsub.f32 1.5, %v1351_v54 }
 0xba0   :  { %v1370_v56 = vadd.f32 %v1552_v53, %v1364_v37 }
 0xba1   :  { %v1353_v57 = vmul.f32 %v1590_v47, %v1352_v55 }
 0xba2   :  { %1372 = vst.msk [vmem:[#allocation14] sm:$0xff] %vm186_vm0, %v1370_v56 }
 0xba3   :  { %v1357_v58 = vsel %vm1356_vm2, %v1590_v47, %v1353_v57 }
 0xba4   :  { %v1359_v59 = vmul.f32 %v1357_v58, %v1325_v32 }
 0xba6   :  { %v1365_v60 = vmul.f32 %v1551_v50, %v1359_v59 }
 0xba8   :  { %v1371_v61 = vadd.f32 %v1552_v53, %v1365_v60 }
 0xbaa   :  { %1373 = vst.msk [vmem:[#allocation14 + $0x8] sm:$0xff] %vm186_vm0, %v1371_v61 }
 0xbab   :  { %1386 = dma.vmem_to_hbm [thread:$0]  %s1379_s20, 256, %s1381_s19, [#allocation4], %s1794_s28, %s1794_s28, %s1795_s4  }
 0xbac   :  { %1791 = dma.done.wait [#allocation4], 256  }
 0xbad   :  { %1792 = vsyncadd [#allocation4], 4294967040 }
 0xbae   :  { %1399 = vsyncpa [#allocation3], 1 }
 0xbaf   :  { %1400 = vsyncpa [#allocation6], 1 }
 0xbb0   :  { %1401 = vsyncpa [#allocation9], 1 }
 0xbb1   :  { %1402 = vsyncpa [#allocation12], 1 }
 0xbb2   :  { %1403 = vsyncpa [#allocation4], 1 }

</bundles_post_ra>
